<compile_context>
chip_gen: v7x
topology: tpu7x:2x2x1
jax: 0.10.0
libtpu: 0.0.40
codegen_flags: <defaults>
</compile_context>

<pallas_src>
from functools import partial

import jax
import jax.numpy as jnp
from jax import lax
from jax.experimental import pallas as pl
from jax.experimental.pallas import tpu as pltpu


_VMEM_LIMIT = 48 * 1024 * 1024  # fits v7x (64 MiB physical); fine on v5e/v6e.


def _compiler_params(sem):
    return pltpu.CompilerParams(dimension_semantics=sem,
                                vmem_limit_bytes=_VMEM_LIMIT)


# ---------------------------------------------------------------------------
# Kernels
# ---------------------------------------------------------------------------
def _conv3x3_s1_kernel(x_ref, w_ref, b_ref, *rest, ho, wo, relu, res_mode):
    """Fused stride-1 3x3 conv (+folded-BN bias) (+residual | fused 1x1
    downsample) (+ReLU) for one image.

    x_ref : ((ho+2)*wo, 3*cin) bf16  width-tap concat, H-padded, row-flattened
    w_ref : (3, 3*cin, cout)   bf16  one weight slab per height tap (BN folded)
    b_ref : (1, cout)          f32   folded BN bias
    res_mode == "add" : rest = (res_ref, o_ref)
    res_mode == "down": rest = (xi_ref, wd_ref, bd_ref, o_ref)
    else              : rest = (o_ref,)
    """
    if res_mode == "add":
        res_ref, o_ref = rest
    elif res_mode == "down":
        xi_ref, wd_ref, bd_ref, o_ref = rest
    else:
        (o_ref,) = rest

    n_rows = ho * wo
    acc = None
    # Height taps accumulate in f32 on-chip; no 9x im2col ever hits HBM.
    for dy in range(3):
        xs = x_ref[pl.ds(dy * wo, n_rows), :]            # (ho*wo, 3*cin) bf16
        d = jnp.dot(xs, w_ref[dy], preferred_element_type=jnp.float32)
        acc = d if acc is None else acc + d

    out = acc + b_ref[...]                               # f32 epilogue
    if res_mode == "add":
        out = out + res_ref[...].astype(jnp.float32)
    elif res_mode == "down":
        ident = jnp.dot(xi_ref[...], wd_ref[...],
                        preferred_element_type=jnp.float32) + bd_ref[...]
        out = out + ident
    if relu:
        out = jnp.maximum(out, 0.0)
    o_ref[...] = out.astype(o_ref.dtype)


def _matmul_bias_kernel(x_ref, w_ref, b_ref, o_ref, *, relu):
    """(tm,K)@(K,N) + bias (+ReLU); bf16 operands, f32 accumulate/epilogue."""
    acc = jnp.dot(x_ref[...], w_ref[...], preferred_element_type=jnp.float32)
    out = acc + b_ref[...]
    if relu:
        out = jnp.maximum(out, 0.0)
    o_ref[...] = out.astype(o_ref.dtype)


# ---------------------------------------------------------------------------
# Pallas wrappers
# ---------------------------------------------------------------------------
def _pick_tm(m, cap=512):
    """Largest multiple-of-8 tile dividing m (capped), preferring >=2 grid
    steps so both v7x TensorCores get work (fixes old tm=M fallback)."""
    fallback = None
    for c in (512, 256, 128, 64, 32, 16, 8):
        if c <= cap and m % c == 0:
            if m // c >= 2:
                return c
            if fallback is None:
                fallback = c
    return fallback if fallback is not None else m


def matmul_bias_act(x, w, bias, relu=False, out_dtype=jnp.bfloat16):
    m, k = x.shape
    n = w.shape[1]
    tm = _pick_tm(m)
    kernel = partial(_matmul_bias_kernel, relu=relu)
    return pl.pallas_call(
        kernel,
        grid=(m // tm,),
        in_specs=[
            pl.BlockSpec((tm, k), lambda i: (i, 0)),
            pl.BlockSpec((k, n), lambda i: (0, 0)),
            pl.BlockSpec((1, n), lambda i: (0, 0)),
        ],
        out_specs=pl.BlockSpec((tm, n), lambda i: (i, 0)),
        out_shape=jax.ShapeDtypeStruct((m, n), out_dtype),
        compiler_params=_compiler_params(("parallel",)),
    )(x.astype(jnp.bfloat16), w.astype(jnp.bfloat16), bias.astype(jnp.float32))


def conv3x3_s1_bn(x, w_slab, bias, relu=True, residual=None, down=None):
    """Fused stride-1 3x3 conv + folded BN (+residual | fused 1x1 downsample)
    (+ReLU).  x: (N,H,W,Cin) bf16; w_slab: (3, 3*Cin, Cout) bf16;
    bias: (1,Cout) f32; residual: (N, H*W, Cout) bf16;
    down = (xi (N,H*W,Cin0) bf16, wd (Cin0,Cout) bf16, bd (1,Cout) f32)."""
    n, h, w_, cin = x.shape
    cout = w_slab.shape[-1]
    ho, wo = h, w_

    # Pad H/W by 1, fold the 3 width taps into the channel axis (3x, bf16) and
    # flatten rows.  The 3 height taps are handled in-kernel (no 9x im2col).
    xp = jnp.pad(x, ((0, 0), (1, 1), (1, 1), (0, 0)))
    xw = jnp.concatenate([xp[:, :, dx:dx + wo, :] for dx in range(3)], axis=-1)
    xw = xw.reshape(n, (h + 2) * wo, 3 * cin)

    in_specs = [
        pl.BlockSpec((None, (h + 2) * wo, 3 * cin), lambda i: (i, 0, 0)),
        pl.BlockSpec((3, 3 * cin, cout), lambda i: (0, 0, 0)),
        pl.BlockSpec((1, cout), lambda i: (0, 0)),
    ]
    args = [xw, w_slab, bias]
    if down is not None:
        xi, wd, bd = down
        cin0 = xi.shape[-1]
        in_specs += [
            pl.BlockSpec((None, ho * wo, cin0), lambda i: (i, 0, 0)),
            pl.BlockSpec((cin0, cout), lambda i: (0, 0)),
            pl.BlockSpec((1, cout), lambda i: (0, 0)),
        ]
        args += [xi, wd, bd]
        res_mode = "down"
    elif residual is not None:
        in_specs.append(pl.BlockSpec((None, ho * wo, cout), lambda i: (i, 0, 0)))
        args.append(residual)
        res_mode = "add"
    else:
        res_mode = "none"

    kernel = partial(_conv3x3_s1_kernel, ho=ho, wo=wo, relu=relu,
                     res_mode=res_mode)
    out = pl.pallas_call(
        kernel,
        grid=(n,),                                 # >=2 steps -> both v7x TCs
        in_specs=in_specs,
        out_specs=pl.BlockSpec((None, ho * wo, cout), lambda i: (i, 0, 0)),
        out_shape=jax.ShapeDtypeStruct((n, ho * wo, cout), jnp.bfloat16),
        compiler_params=_compiler_params(("parallel",)),
    )(*args)
    return out.reshape(n, ho, wo, cout)


def conv3x3_im2col_bn(x, w_flat, bias, stride, relu=True):
    """3x3 conv via im2col + tiled matmul.  Only used for stride>1 convs where
    the im2col expansion is ~9/stride^2 (~2.25x for stride 2); the dominant
    stride-1 convs use conv3x3_s1_bn instead."""
    n, h, w_, cin = x.shape
    cout = w_flat.shape[-1]
    xp = jnp.pad(x, ((0, 0), (1, 1), (1, 1), (0, 0)))
    ho = (h + 2 - 3) // stride + 1
    wo = (w_ + 2 - 3) // stride + 1
    taps = [xp[:, dy:dy + (ho - 1) * stride + 1:stride,
               dx:dx + (wo - 1) * stride + 1:stride, :]
            for dy in range(3) for dx in range(3)]
    cols = jnp.stack(taps, axis=3).reshape(n * ho * wo, 9 * cin)
    out = matmul_bias_act(cols, w_flat, bias, relu=relu)
    return out.reshape(n, ho, wo, cout)


# ---------------------------------------------------------------------------
# BN folding / weight layout helpers (feedback: fold BN scale into weights)
# ---------------------------------------------------------------------------
def _fold_bn(w_oihw, bn, eps=1e-5):
    scale = bn["gamma"] / jnp.sqrt(bn["var"] + eps)          # (Cout,)
    bias = bn["beta"] - bn["mean"] * scale                   # (Cout,)
    w = w_oihw * scale[:, None, None, None]
    return w, bias.reshape(1, -1).astype(jnp.float32)


def _slab3x3(w_oihw):
    """(Cout,Cin,3,3) -> (3, 3*Cin, Cout) bf16 (one slab per height tap)."""
    cout, cin = w_oihw.shape[0], w_oihw.shape[1]
    w_t = jnp.transpose(w_oihw, (2, 3, 1, 0))                # (3,3,Cin,Cout)
    return w_t.reshape(3, 3 * cin, cout).astype(jnp.bfloat16)


def _flat3x3(w_oihw):
    """(Cout,Cin,3,3) -> (9*Cin, Cout) bf16 (im2col layout)."""
    cout, cin = w_oihw.shape[0], w_oihw.shape[1]
    w_t = jnp.transpose(w_oihw, (2, 3, 1, 0))
    return w_t.reshape(9 * cin, cout).astype(jnp.bfloat16)


# ---------------------------------------------------------------------------
# BasicBlock forward (matches the PyTorch module semantics)
# ---------------------------------------------------------------------------
def basic_block(x, params, stride):
    """x: (N,H,W,Cin) bf16 NHWC -> (N,Ho,Wo,Cout) bf16 NHWC."""
    n, h, w_, cin = x.shape

    # conv1 + bn1 + relu
    w1, b1 = _fold_bn(params["conv1_w"], params["bn1"])
    if stride == 1:
        out = conv3x3_s1_bn(x, _slab3x3(w1), b1, relu=True)
    else:
        out = conv3x3_im2col_bn(x, _flat3x3(w1), b1, stride, relu=True)
    ho, wo = out.shape[1], out.shape[2]

    # conv2 + bn2 + residual (+ fused 1x1 downsample) + relu in ONE kernel.
    w2, b2 = _fold_bn(params["conv2_w"], params["bn2"])
    if "down_w" in params:
        wd, bd = _fold_bn(params["down_w"], params["down_bn"])
        wd = jnp.transpose(wd[:, :, 0, 0], (1, 0)).astype(jnp.bfloat16)
        xi = x[:, ::stride, ::stride, :].reshape(n, ho * wo, cin)
        out = conv3x3_s1_bn(out, _slab3x3(w2), b2, relu=True,
                            down=(xi, wd, bd))
    else:
        res = x.reshape(n, ho * wo, cin)
        out = conv3x3_s1_bn(out, _slab3x3(w2), b2, relu=True, residual=res)
    return out


def basic_block_stack_forward(blocks, x_nchw):
    """PyTorch-style NCHW in / NCHW out; bf16 compute inside."""
    x = jnp.transpose(x_nchw, (0, 2, 3, 1)).astype(jnp.bfloat16)
    for p, stride in blocks:
        x = basic_block(x, p, stride)
    return jnp.transpose(x.astype(jnp.float32), (0, 3, 1, 2))


# ---------------------------------------------------------------------------
# Pure-JAX reference (exact PyTorch BasicBlock semantics, f32)
# ---------------------------------------------------------------------------
def _ref_conv(x, w, stride, padding):
    return lax.conv_general_dilated(
        x, w, (stride, stride), [(padding, padding), (padding, padding)],
        dimension_numbers=("NHWC", "OIHW", "NHWC"),
        precision=lax.Precision.HIGHEST)


def _ref_bn(x, bn, eps=1e-5):
    scale = bn["gamma"] / jnp.sqrt(bn["var"] + eps)
    return x * scale + (bn["beta"] - bn["mean"] * scale)


def ref_basic_block(x, params, stride):
    out = jax.nn.relu(_ref_bn(_ref_conv(x, params["conv1_w"], stride, 1),
                              params["bn1"]))
    out = _ref_bn(_ref_conv(out, params["conv2_w"], 1, 1), params["bn2"])
    if "down_w" in params:
        identity = _ref_bn(_ref_conv(x, params["down_w"], stride, 0),
                           params["down_bn"])
    else:
        identity = x
    return jax.nn.relu(out + identity)


# ---------------------------------------------------------------------------
# Parameter construction
# ---------------------------------------------------------------------------
def _kaiming(key, cout, cin, kh, kw):
    std = (2.0 / (cout * kh * kw)) ** 0.5
    return jax.random.normal(key, (cout, cin, kh, kw), jnp.float32) * std


def _bn_params(key, c):
    k1, k2, k3, k4 = jax.random.split(key, 4)
    return dict(gamma=jax.random.uniform(k1, (c,), jnp.float32, 0.5, 1.5),
                beta=jax.random.normal(k2, (c,), jnp.float32) * 0.1,
                mean=jax.random.normal(k3, (c,), jnp.float32) * 0.1,
                var=jax.random.uniform(k4, (c,), jnp.float32, 0.5, 1.5))


def make_basic_block_params(key, inplanes, planes, stride):
    ks = jax.random.split(key, 6)
    p = dict(conv1_w=_kaiming(ks[0], planes, inplanes, 3, 3),
             bn1=_bn_params(ks[1], planes),
             conv2_w=_kaiming(ks[2], planes, planes, 3, 3),
             bn2=_bn_params(ks[3], planes))
    if stride != 1 or inplanes != planes:
        p["down_w"] = _kaiming(ks[4], planes, inplanes, 1, 1)
        p["down_bn"] = _bn_params(ks[5], planes)
    return p


# ---------------------------------------------------------------------------
if __name__ == "__main__":
    key = jax.random.PRNGKey(0)
    kx, ka, kb = jax.random.split(key, 3)

    # Two BasicBlocks exercising both code paths:
    #   A: 64 -> 128, stride 2, 1x1 downsample fused into the conv2 kernel
    #   B: 128 -> 128, stride 1, identity residual
    x = jax.random.normal(kx, (2, 64, 16, 16), jnp.float32)   # NCHW, PyTorch style
    params_a = make_basic_block_params(ka, 64, 128, stride=2)
    params_b = make_basic_block_params(kb, 128, 128, stride=1)
    blocks = [(params_a, 2), (params_b, 1)]

    fwd = jax.jit(partial(basic_block_stack_forward, blocks))
    out = jax.block_until_ready(fwd(x))

    # Reference check (bf16 kernel path vs f32 reference).
    x_nhwc = jnp.transpose(x, (0, 2, 3, 1))
    ref = ref_basic_block(ref_basic_block(x_nhwc, params_a, 2), params_b, 1)
    ref = jnp.transpose(ref, (0, 3, 1, 2))

    assert out.shape == ref.shape == (2, 128, 8, 8)
    assert bool(jnp.all(jnp.isfinite(out)))
    rel_err = float(jnp.max(jnp.abs(out - ref)) / (jnp.max(jnp.abs(ref)) + 1e-6))
    assert rel_err < 5e-2, f"mismatch vs reference: rel_err={rel_err}"
    print("KERNEL_OK")
</pallas_src>

<mosaic_0001>
module attributes {stable_mosaic.version = 11 : i64} {
  func.func @_matmul_bias_kernel(%arg0: i32, %arg1: memref<64x576xbf16, #tpu.memory_space<vmem>>, %arg2: memref<576x128xbf16, #tpu.memory_space<vmem>>, %arg3: memref<1x128xf32, #tpu.memory_space<vmem>>, %arg4: memref<64x128xbf16, #tpu.memory_space<vmem>>) attributes {dimension_semantics = [#tpu.dimension_semantics<parallel>], iteration_bounds = array<i64: 2>, scalar_prefetch = 0 : i64, scratch_operands = 0 : i64, tpu.core_type = #tpu.core_type<tc>, window_params = [{transform_indices = @transform_0, window_bounds = array<i64: 64, 576>}, {pipeline_mode = #tpu.pipeline_mode<synchronous>, transform_indices = @transform_1, window_bounds = array<i64: 576, 128>}, {pipeline_mode = #tpu.pipeline_mode<synchronous>, transform_indices = @transform_2, window_bounds = array<i64: 1, 128>}, {transform_indices = @transform_3, window_bounds = array<i64: 64, 128>}]} {
    %c0 = arith.constant 0 : index
    %c0_0 = arith.constant 0 : index
    %0 = vector.load %arg1[%c0, %c0_0] : memref<64x576xbf16, #tpu.memory_space<vmem>>, vector<64x576xbf16>
    %c0_1 = arith.constant 0 : index
    %c0_2 = arith.constant 0 : index
    %1 = vector.load %arg2[%c0_1, %c0_2] : memref<576x128xbf16, #tpu.memory_space<vmem>>, vector<576x128xbf16>
    %cst = arith.constant dense<0.000000e+00> : vector<64x128xf32>
    %2 = tpu.matmul %0, %1, %cst {dimension_numbers = #tpu.dot_dimension_numbers<[1], [0], [0], [1], [0, 0, 1, 1], [], []>} : vector<64x576xbf16>, vector<576x128xbf16>, vector<64x128xf32> -> vector<64x128xf32>
    %c0_3 = arith.constant 0 : index
    %c0_4 = arith.constant 0 : index
    %3 = vector.load %arg3[%c0_3, %c0_4] : memref<1x128xf32, #tpu.memory_space<vmem>>, vector<1x128xf32>
    %4 = vector.broadcast %3 : vector<1x128xf32> to vector<64x128xf32>
    %5 = arith.addf %2, %4 : vector<64x128xf32>
    %cst_5 = arith.constant 0.000000e+00 : f32
    %6 = vector.broadcast %cst_5 : f32 to vector<64x128xf32>
    %7 = arith.maximumf %5, %6 : vector<64x128xf32>
    %8 = arith.truncf %7 : vector<64x128xf32> to vector<64x128xbf16>
    %c0_6 = arith.constant 0 : index
    %c0_7 = arith.constant 0 : index
    %9 = vector.load %arg4[%c0_6, %c0_7] : memref<64x128xbf16, #tpu.memory_space<vmem>>, vector<64x128xbf16>
    tpu.vector_store %arg4[%c0_6, %c0_7], %8 {strides = array<i32>} : memref<64x128xbf16, #tpu.memory_space<vmem>>, vector<64x128xbf16>,
    return
  }
  func.func @transform_0(%arg0: i32) -> (i32, i32) {
    %c0_i32 = arith.constant 0 : i32
    %c0_i32_0 = arith.constant 0 : i32
    return %arg0, %c0_i32 : i32, i32
  }
  func.func @transform_1(%arg0: i32) -> (i32, i32) {
    %c0_i32 = arith.constant 0 : i32
    %c0_i32_0 = arith.constant 0 : i32
    %c0_i32_1 = arith.constant 0 : i32
    return %c0_i32, %c0_i32_0 : i32, i32
  }
  func.func @transform_2(%arg0: i32) -> (i32, i32) {
    %c0_i32 = arith.constant 0 : i32
    %c0_i32_0 = arith.constant 0 : i32
    %c0_i32_1 = arith.constant 0 : i32
    return %c0_i32, %c0_i32_0 : i32, i32
  }
  func.func @transform_3(%arg0: i32) -> (i32, i32) {
    %c0_i32 = arith.constant 0 : i32
    %c0_i32_0 = arith.constant 0 : i32
    return %arg0, %c0_i32 : i32, i32
  }
}

module attributes {stable_mosaic.version = 11 : i64} {
  func.func @_conv3x3_s1_kernel(%arg0: i32, %arg1: memref<1x80x384xbf16, #tpu.memory_space<vmem>>, %arg2: memref<3x384x128xbf16, #tpu.memory_space<vmem>>, %arg3: memref<1x128xf32, #tpu.memory_space<vmem>>, %arg4: memref<1x64x64xbf16, #tpu.memory_space<vmem>>, %arg5: memref<64x128xbf16, #tpu.memory_space<vmem>>, %arg6: memref<1x128xf32, #tpu.memory_space<vmem>>, %arg7: memref<1x64x128xbf16, #tpu.memory_space<vmem>>) attributes {dimension_semantics = [#tpu.dimension_semantics<parallel>], iteration_bounds = array<i64: 2>, scalar_prefetch = 0 : i64, scratch_operands = 0 : i64, tpu.core_type = #tpu.core_type<tc>, window_params = [{transform_indices = @transform_0, window_bounds = array<i64: 1, 80, 384>}, {pipeline_mode = #tpu.pipeline_mode<synchronous>, transform_indices = @transform_1, window_bounds = array<i64: 3, 384, 128>}, {pipeline_mode = #tpu.pipeline_mode<synchronous>, transform_indices = @transform_2, window_bounds = array<i64: 1, 128>}, {transform_indices = @transform_3, window_bounds = array<i64: 1, 64, 64>}, {pipeline_mode = #tpu.pipeline_mode<synchronous>, transform_indices = @transform_4, window_bounds = array<i64: 64, 128>}, {pipeline_mode = #tpu.pipeline_mode<synchronous>, transform_indices = @transform_5, window_bounds = array<i64: 1, 128>}, {transform_indices = @transform_6, window_bounds = array<i64: 1, 64, 128>}]} {
    %c0 = arith.constant 0 : index
    %c0_0 = arith.constant 0 : index
    %c0_1 = arith.constant 0 : index
    %0 = vector.load %arg1[%c0, %c0_0, %c0_1] : memref<1x80x384xbf16, #tpu.memory_space<vmem>>, vector<1x64x384xbf16>
    %1 = vector.shape_cast %0 : vector<1x64x384xbf16> to vector<64x384xbf16>
    %c0_2 = arith.constant 0 : index
    %c0_3 = arith.constant 0 : index
    %c0_4 = arith.constant 0 : index
    %2 = vector.load %arg2[%c0_2, %c0_3, %c0_4] : memref<3x384x128xbf16, #tpu.memory_space<vmem>>, vector<1x384x128xbf16>
    %3 = vector.shape_cast %2 : vector<1x384x128xbf16> to vector<384x128xbf16>
    %cst = arith.constant dense<0.000000e+00> : vector<64x128xf32>
    %4 = tpu.matmul %1, %3, %cst {dimension_numbers = #tpu.dot_dimension_numbers<[1], [0], [0], [1], [0, 0, 1, 1], [], []>} : vector<64x384xbf16>, vector<384x128xbf16>, vector<64x128xf32> -> vector<64x128xf32>
    %c0_5 = arith.constant 0 : index
    %c8 = arith.constant 8 : index
    %c0_6 = arith.constant 0 : index
    %5 = vector.load %arg1[%c0_5, %c8, %c0_6] : memref<1x80x384xbf16, #tpu.memory_space<vmem>>, vector<1x64x384xbf16>
    %6 = vector.shape_cast %5 : vector<1x64x384xbf16> to vector<64x384xbf16>
    %c1 = arith.constant 1 : index
    %c0_7 = arith.constant 0 : index
    %c0_8 = arith.constant 0 : index
    %7 = vector.load %arg2[%c1, %c0_7, %c0_8] : memref<3x384x128xbf16, #tpu.memory_space<vmem>>, vector<1x384x128xbf16>
    %8 = vector.shape_cast %7 : vector<1x384x128xbf16> to vector<384x128xbf16>
    %cst_9 = arith.constant dense<0.000000e+00> : vector<64x128xf32>
    %9 = tpu.matmul %6, %8, %cst_9 {dimension_numbers = #tpu.dot_dimension_numbers<[1], [0], [0], [1], [0, 0, 1, 1], [], []>} : vector<64x384xbf16>, vector<384x128xbf16>, vector<64x128xf32> -> vector<64x128xf32>
    %10 = arith.addf %4, %9 : vector<64x128xf32>
    %c0_10 = arith.constant 0 : index
    %c16 = arith.constant 16 : index
    %c0_11 = arith.constant 0 : index
    %11 = vector.load %arg1[%c0_10, %c16, %c0_11] : memref<1x80x384xbf16, #tpu.memory_space<vmem>>, vector<1x64x384xbf16>
    %12 = vector.shape_cast %11 : vector<1x64x384xbf16> to vector<64x384xbf16>
    %c2 = arith.constant 2 : index
    %c0_12 = arith.constant 0 : index
    %c0_13 = arith.constant 0 : index
    %13 = vector.load %arg2[%c2, %c0_12, %c0_13] : memref<3x384x128xbf16, #tpu.memory_space<vmem>>, vector<1x384x128xbf16>
    %14 = vector.shape_cast %13 : vector<1x384x128xbf16> to vector<384x128xbf16>
    %cst_14 = arith.constant dense<0.000000e+00> : vector<64x128xf32>
    %15 = tpu.matmul %12, %14, %cst_14 {dimension_numbers = #tpu.dot_dimension_numbers<[1], [0], [0], [1], [0, 0, 1, 1], [], []>} : vector<64x384xbf16>, vector<384x128xbf16>, vector<64x128xf32> -> vector<64x128xf32>
    %16 = arith.addf %10, %15 : vector<64x128xf32>
    %c0_15 = arith.constant 0 : index
    %c0_16 = arith.constant 0 : index
    %17 = vector.load %arg3[%c0_15, %c0_16] : memref<1x128xf32, #tpu.memory_space<vmem>>, vector<1x128xf32>
    %18 = vector.broadcast %17 : vector<1x128xf32> to vector<64x128xf32>
    %19 = arith.addf %16, %18 : vector<64x128xf32>
    %c0_17 = arith.constant 0 : index
    %c0_18 = arith.constant 0 : index
    %c0_19 = arith.constant 0 : index
    %20 = vector.load %arg4[%c0_17, %c0_18, %c0_19] : memref<1x64x64xbf16, #tpu.memory_space<vmem>>, vector<1x64x64xbf16>
    %21 = vector.shape_cast %20 : vector<1x64x64xbf16> to vector<64x64xbf16>
    %c0_20 = arith.constant 0 : index
    %c0_21 = arith.constant 0 : index
    %22 = vector.load %arg5[%c0_20, %c0_21] : memref<64x128xbf16, #tpu.memory_space<vmem>>, vector<64x128xbf16>
    %cst_22 = arith.constant dense<0.000000e+00> : vector<64x128xf32>
    %23 = tpu.matmul %21, %22, %cst_22 {dimension_numbers = #tpu.dot_dimension_numbers<[1], [0], [0], [1], [0, 0, 1, 1], [], []>} : vector<64x64xbf16>, vector<64x128xbf16>, vector<64x128xf32> -> vector<64x128xf32>
    %c0_23 = arith.constant 0 : index
    %c0_24 = arith.constant 0 : index
    %24 = vector.load %arg6[%c0_23, %c0_24] : memref<1x128xf32, #tpu.memory_space<vmem>>, vector<1x128xf32>
    %25 = vector.broadcast %24 : vector<1x128xf32> to vector<64x128xf32>
    %26 = arith.addf %23, %25 : vector<64x128xf32>
    %27 = arith.addf %19, %26 : vector<64x128xf32>
    %cst_25 = arith.constant 0.000000e+00 : f32
    %28 = vector.broadcast %cst_25 : f32 to vector<64x128xf32>
    %29 = arith.maximumf %27, %28 : vector<64x128xf32>
    %30 = arith.truncf %29 : vector<64x128xf32> to vector<64x128xbf16>
    %c0_26 = arith.constant 0 : index
    %c0_27 = arith.constant 0 : index
    %c0_28 = arith.constant 0 : index
    %31 = vector.load %arg7[%c0_26, %c0_27, %c0_28] : memref<1x64x128xbf16, #tpu.memory_space<vmem>>, vector<1x64x128xbf16>
    %32 = vector.shape_cast %31 : vector<1x64x128xbf16> to vector<64x128xbf16>
    %33 = vector.shape_cast %30 : vector<64x128xbf16> to vector<1x64x128xbf16>
    tpu.vector_store %arg7[%c0_26, %c0_27, %c0_28], %33 {strides = array<i32>} : memref<1x64x128xbf16, #tpu.memory_space<vmem>>, vector<1x64x128xbf16>,
    return
  }
  func.func @transform_0(%arg0: i32) -> (i32, i32, i32) {
    %c0_i32 = arith.constant 0 : i32
    %c0_i32_0 = arith.constant 0 : i32
    %c0_i32_1 = arith.constant 0 : i32
    return %arg0, %c0_i32, %c0_i32_0 : i32, i32, i32
  }
  func.func @transform_1(%arg0: i32) -> (i32, i32, i32) {
    %c0_i32 = arith.constant 0 : i32
    %c0_i32_0 = arith.constant 0 : i32
    %c0_i32_1 = arith.constant 0 : i32
    %c0_i32_2 = arith.constant 0 : i32
    return %c0_i32, %c0_i32_0, %c0_i32_1 : i32, i32, i32
  }
  func.func @transform_2(%arg0: i32) -> (i32, i32) {
    %c0_i32 = arith.constant 0 : i32
    %c0_i32_0 = arith.constant 0 : i32
    %c0_i32_1 = arith.constant 0 : i32
    return %c0_i32, %c0_i32_0 : i32, i32
  }
  func.func @transform_3(%arg0: i32) -> (i32, i32, i32) {
    %c0_i32 = arith.constant 0 : i32
    %c0_i32_0 = arith.constant 0 : i32
    %c0_i32_1 = arith.constant 0 : i32
    return %arg0, %c0_i32, %c0_i32_0 : i32, i32, i32
  }
  func.func @transform_4(%arg0: i32) -> (i32, i32) {
    %c0_i32 = arith.constant 0 : i32
    %c0_i32_0 = arith.constant 0 : i32
    %c0_i32_1 = arith.constant 0 : i32
    return %c0_i32, %c0_i32_0 : i32, i32
  }
  func.func @transform_5(%arg0: i32) -> (i32, i32) {
    %c0_i32 = arith.constant 0 : i32
    %c0_i32_0 = arith.constant 0 : i32
    %c0_i32_1 = arith.constant 0 : i32
    return %c0_i32, %c0_i32_0 : i32, i32
  }
  func.func @transform_6(%arg0: i32) -> (i32, i32, i32) {
    %c0_i32 = arith.constant 0 : i32
    %c0_i32_0 = arith.constant 0 : i32
    %c0_i32_1 = arith.constant 0 : i32
    return %arg0, %c0_i32, %c0_i32_0 : i32, i32, i32
  }
}

module attributes {stable_mosaic.version = 11 : i64} {
  func.func @_conv3x3_s1_kernel(%arg0: i32, %arg1: memref<1x80x384xbf16, #tpu.memory_space<vmem>>, %arg2: memref<3x384x128xbf16, #tpu.memory_space<vmem>>, %arg3: memref<1x128xf32, #tpu.memory_space<vmem>>, %arg4: memref<1x64x128xbf16, #tpu.memory_space<vmem>>) attributes {dimension_semantics = [#tpu.dimension_semantics<parallel>], iteration_bounds = array<i64: 2>, scalar_prefetch = 0 : i64, scratch_operands = 0 : i64, tpu.core_type = #tpu.core_type<tc>, window_params = [{transform_indices = @transform_0, window_bounds = array<i64: 1, 80, 384>}, {pipeline_mode = #tpu.pipeline_mode<synchronous>, transform_indices = @transform_1, window_bounds = array<i64: 3, 384, 128>}, {pipeline_mode = #tpu.pipeline_mode<synchronous>, transform_indices = @transform_2, window_bounds = array<i64: 1, 128>}, {transform_indices = @transform_3, window_bounds = array<i64: 1, 64, 128>}]} {
    %c0 = arith.constant 0 : index
    %c0_0 = arith.constant 0 : index
    %c0_1 = arith.constant 0 : index
    %0 = vector.load %arg1[%c0, %c0_0, %c0_1] : memref<1x80x384xbf16, #tpu.memory_space<vmem>>, vector<1x64x384xbf16>
    %1 = vector.shape_cast %0 : vector<1x64x384xbf16> to vector<64x384xbf16>
    %c0_2 = arith.constant 0 : index
    %c0_3 = arith.constant 0 : index
    %c0_4 = arith.constant 0 : index
    %2 = vector.load %arg2[%c0_2, %c0_3, %c0_4] : memref<3x384x128xbf16, #tpu.memory_space<vmem>>, vector<1x384x128xbf16>
    %3 = vector.shape_cast %2 : vector<1x384x128xbf16> to vector<384x128xbf16>
    %cst = arith.constant dense<0.000000e+00> : vector<64x128xf32>
    %4 = tpu.matmul %1, %3, %cst {dimension_numbers = #tpu.dot_dimension_numbers<[1], [0], [0], [1], [0, 0, 1, 1], [], []>} : vector<64x384xbf16>, vector<384x128xbf16>, vector<64x128xf32> -> vector<64x128xf32>
    %c0_5 = arith.constant 0 : index
    %c8 = arith.constant 8 : index
    %c0_6 = arith.constant 0 : index
    %5 = vector.load %arg1[%c0_5, %c8, %c0_6] : memref<1x80x384xbf16, #tpu.memory_space<vmem>>, vector<1x64x384xbf16>
    %6 = vector.shape_cast %5 : vector<1x64x384xbf16> to vector<64x384xbf16>
    %c1 = arith.constant 1 : index
    %c0_7 = arith.constant 0 : index
    %c0_8 = arith.constant 0 : index
    %7 = vector.load %arg2[%c1, %c0_7, %c0_8] : memref<3x384x128xbf16, #tpu.memory_space<vmem>>, vector<1x384x128xbf16>
    %8 = vector.shape_cast %7 : vector<1x384x128xbf16> to vector<384x128xbf16>
    %cst_9 = arith.constant dense<0.000000e+00> : vector<64x128xf32>
    %9 = tpu.matmul %6, %8, %cst_9 {dimension_numbers = #tpu.dot_dimension_numbers<[1], [0], [0], [1], [0, 0, 1, 1], [], []>} : vector<64x384xbf16>, vector<384x128xbf16>, vector<64x128xf32> -> vector<64x128xf32>
    %10 = arith.addf %4, %9 : vector<64x128xf32>
    %c0_10 = arith.constant 0 : index
    %c16 = arith.constant 16 : index
    %c0_11 = arith.constant 0 : index
    %11 = vector.load %arg1[%c0_10, %c16, %c0_11] : memref<1x80x384xbf16, #tpu.memory_space<vmem>>, vector<1x64x384xbf16>
    %12 = vector.shape_cast %11 : vector<1x64x384xbf16> to vector<64x384xbf16>
    %c2 = arith.constant 2 : index
    %c0_12 = arith.constant 0 : index
    %c0_13 = arith.constant 0 : index
    %13 = vector.load %arg2[%c2, %c0_12, %c0_13] : memref<3x384x128xbf16, #tpu.memory_space<vmem>>, vector<1x384x128xbf16>
    %14 = vector.shape_cast %13 : vector<1x384x128xbf16> to vector<384x128xbf16>
    %cst_14 = arith.constant dense<0.000000e+00> : vector<64x128xf32>
    %15 = tpu.matmul %12, %14, %cst_14 {dimension_numbers = #tpu.dot_dimension_numbers<[1], [0], [0], [1], [0, 0, 1, 1], [], []>} : vector<64x384xbf16>, vector<384x128xbf16>, vector<64x128xf32> -> vector<64x128xf32>
    %16 = arith.addf %10, %15 : vector<64x128xf32>
    %c0_15 = arith.constant 0 : index
    %c0_16 = arith.constant 0 : index
    %17 = vector.load %arg3[%c0_15, %c0_16] : memref<1x128xf32, #tpu.memory_space<vmem>>, vector<1x128xf32>
    %18 = vector.broadcast %17 : vector<1x128xf32> to vector<64x128xf32>
    %19 = arith.addf %16, %18 : vector<64x128xf32>
    %cst_17 = arith.constant 0.000000e+00 : f32
    %20 = vector.broadcast %cst_17 : f32 to vector<64x128xf32>
    %21 = arith.maximumf %19, %20 : vector<64x128xf32>
    %22 = arith.truncf %21 : vector<64x128xf32> to vector<64x128xbf16>
    %c0_18 = arith.constant 0 : index
    %c0_19 = arith.constant 0 : index
    %c0_20 = arith.constant 0 : index
    %23 = vector.load %arg4[%c0_18, %c0_19, %c0_20] : memref<1x64x128xbf16, #tpu.memory_space<vmem>>, vector<1x64x128xbf16>
    %24 = vector.shape_cast %23 : vector<1x64x128xbf16> to vector<64x128xbf16>
    %25 = vector.shape_cast %22 : vector<64x128xbf16> to vector<1x64x128xbf16>
    tpu.vector_store %arg4[%c0_18, %c0_19, %c0_20], %25 {strides = array<i32>} : memref<1x64x128xbf16, #tpu.memory_space<vmem>>, vector<1x64x128xbf16>,
    return
  }
  func.func @transform_0(%arg0: i32) -> (i32, i32, i32) {
    %c0_i32 = arith.constant 0 : i32
    %c0_i32_0 = arith.constant 0 : i32
    %c0_i32_1 = arith.constant 0 : i32
    return %arg0, %c0_i32, %c0_i32_0 : i32, i32, i32
  }
  func.func @transform_1(%arg0: i32) -> (i32, i32, i32) {
    %c0_i32 = arith.constant 0 : i32
    %c0_i32_0 = arith.constant 0 : i32
    %c0_i32_1 = arith.constant 0 : i32
    %c0_i32_2 = arith.constant 0 : i32
    return %c0_i32, %c0_i32_0, %c0_i32_1 : i32, i32, i32
  }
  func.func @transform_2(%arg0: i32) -> (i32, i32) {
    %c0_i32 = arith.constant 0 : i32
    %c0_i32_0 = arith.constant 0 : i32
    %c0_i32_1 = arith.constant 0 : i32
    return %c0_i32, %c0_i32_0 : i32, i32
  }
  func.func @transform_3(%arg0: i32) -> (i32, i32, i32) {
    %c0_i32 = arith.constant 0 : i32
    %c0_i32_0 = arith.constant 0 : i32
    %c0_i32_1 = arith.constant 0 : i32
    return %arg0, %c0_i32, %c0_i32_0 : i32, i32, i32
  }
}

module attributes {stable_mosaic.version = 11 : i64} {
  func.func @_conv3x3_s1_kernel(%arg0: i32, %arg1: memref<1x80x384xbf16, #tpu.memory_space<vmem>>, %arg2: memref<3x384x128xbf16, #tpu.memory_space<vmem>>, %arg3: memref<1x128xf32, #tpu.memory_space<vmem>>, %arg4: memref<1x64x128xbf16, #tpu.memory_space<vmem>>, %arg5: memref<1x64x128xbf16, #tpu.memory_space<vmem>>) attributes {dimension_semantics = [#tpu.dimension_semantics<parallel>], iteration_bounds = array<i64: 2>, scalar_prefetch = 0 : i64, scratch_operands = 0 : i64, tpu.core_type = #tpu.core_type<tc>, window_params = [{transform_indices = @transform_0, window_bounds = array<i64: 1, 80, 384>}, {pipeline_mode = #tpu.pipeline_mode<synchronous>, transform_indices = @transform_1, window_bounds = array<i64: 3, 384, 128>}, {pipeline_mode = #tpu.pipeline_mode<synchronous>, transform_indices = @transform_2, window_bounds = array<i64: 1, 128>}, {transform_indices = @transform_3, window_bounds = array<i64: 1, 64, 128>}, {transform_indices = @transform_4, window_bounds = array<i64: 1, 64, 128>}]} {
    %c0 = arith.constant 0 : index
    %c0_0 = arith.constant 0 : index
    %c0_1 = arith.constant 0 : index
    %0 = vector.load %arg1[%c0, %c0_0, %c0_1] : memref<1x80x384xbf16, #tpu.memory_space<vmem>>, vector<1x64x384xbf16>
    %1 = vector.shape_cast %0 : vector<1x64x384xbf16> to vector<64x384xbf16>
    %c0_2 = arith.constant 0 : index
    %c0_3 = arith.constant 0 : index
    %c0_4 = arith.constant 0 : index
    %2 = vector.load %arg2[%c0_2, %c0_3, %c0_4] : memref<3x384x128xbf16, #tpu.memory_space<vmem>>, vector<1x384x128xbf16>
    %3 = vector.shape_cast %2 : vector<1x384x128xbf16> to vector<384x128xbf16>
    %cst = arith.constant dense<0.000000e+00> : vector<64x128xf32>
    %4 = tpu.matmul %1, %3, %cst {dimension_numbers = #tpu.dot_dimension_numbers<[1], [0], [0], [1], [0, 0, 1, 1], [], []>} : vector<64x384xbf16>, vector<384x128xbf16>, vector<64x128xf32> -> vector<64x128xf32>
    %c0_5 = arith.constant 0 : index
    %c8 = arith.constant 8 : index
    %c0_6 = arith.constant 0 : index
    %5 = vector.load %arg1[%c0_5, %c8, %c0_6] : memref<1x80x384xbf16, #tpu.memory_space<vmem>>, vector<1x64x384xbf16>
    %6 = vector.shape_cast %5 : vector<1x64x384xbf16> to vector<64x384xbf16>
    %c1 = arith.constant 1 : index
    %c0_7 = arith.constant 0 : index
    %c0_8 = arith.constant 0 : index
    %7 = vector.load %arg2[%c1, %c0_7, %c0_8] : memref<3x384x128xbf16, #tpu.memory_space<vmem>>, vector<1x384x128xbf16>
    %8 = vector.shape_cast %7 : vector<1x384x128xbf16> to vector<384x128xbf16>
    %cst_9 = arith.constant dense<0.000000e+00> : vector<64x128xf32>
    %9 = tpu.matmul %6, %8, %cst_9 {dimension_numbers = #tpu.dot_dimension_numbers<[1], [0], [0], [1], [0, 0, 1, 1], [], []>} : vector<64x384xbf16>, vector<384x128xbf16>, vector<64x128xf32> -> vector<64x128xf32>
    %10 = arith.addf %4, %9 : vector<64x128xf32>
    %c0_10 = arith.constant 0 : index
    %c16 = arith.constant 16 : index
    %c0_11 = arith.constant 0 : index
    %11 = vector.load %arg1[%c0_10, %c16, %c0_11] : memref<1x80x384xbf16, #tpu.memory_space<vmem>>, vector<1x64x384xbf16>
    %12 = vector.shape_cast %11 : vector<1x64x384xbf16> to vector<64x384xbf16>
    %c2 = arith.constant 2 : index
    %c0_12 = arith.constant 0 : index
    %c0_13 = arith.constant 0 : index
    %13 = vector.load %arg2[%c2, %c0_12, %c0_13] : memref<3x384x128xbf16, #tpu.memory_space<vmem>>, vector<1x384x128xbf16>
    %14 = vector.shape_cast %13 : vector<1x384x128xbf16> to vector<384x128xbf16>
    %cst_14 = arith.constant dense<0.000000e+00> : vector<64x128xf32>
    %15 = tpu.matmul %12, %14, %cst_14 {dimension_numbers = #tpu.dot_dimension_numbers<[1], [0], [0], [1], [0, 0, 1, 1], [], []>} : vector<64x384xbf16>, vector<384x128xbf16>, vector<64x128xf32> -> vector<64x128xf32>
    %16 = arith.addf %10, %15 : vector<64x128xf32>
    %c0_15 = arith.constant 0 : index
    %c0_16 = arith.constant 0 : index
    %17 = vector.load %arg3[%c0_15, %c0_16] : memref<1x128xf32, #tpu.memory_space<vmem>>, vector<1x128xf32>
    %18 = vector.broadcast %17 : vector<1x128xf32> to vector<64x128xf32>
    %19 = arith.addf %16, %18 : vector<64x128xf32>
    %c0_17 = arith.constant 0 : index
    %c0_18 = arith.constant 0 : index
    %c0_19 = arith.constant 0 : index
    %20 = vector.load %arg4[%c0_17, %c0_18, %c0_19] : memref<1x64x128xbf16, #tpu.memory_space<vmem>>, vector<1x64x128xbf16>
    %21 = vector.shape_cast %20 : vector<1x64x128xbf16> to vector<64x128xbf16>
    %22 = arith.extf %21 : vector<64x128xbf16> to vector<64x128xf32>
    %23 = arith.addf %19, %22 : vector<64x128xf32>
    %cst_20 = arith.constant 0.000000e+00 : f32
    %24 = vector.broadcast %cst_20 : f32 to vector<64x128xf32>
    %25 = arith.maximumf %23, %24 : vector<64x128xf32>
    %26 = arith.truncf %25 : vector<64x128xf32> to vector<64x128xbf16>
    %c0_21 = arith.constant 0 : index
    %c0_22 = arith.constant 0 : index
    %c0_23 = arith.constant 0 : index
    %27 = vector.load %arg5[%c0_21, %c0_22, %c0_23] : memref<1x64x128xbf16, #tpu.memory_space<vmem>>, vector<1x64x128xbf16>
    %28 = vector.shape_cast %27 : vector<1x64x128xbf16> to vector<64x128xbf16>
    %29 = vector.shape_cast %26 : vector<64x128xbf16> to vector<1x64x128xbf16>
    tpu.vector_store %arg5[%c0_21, %c0_22, %c0_23], %29 {strides = array<i32>} : memref<1x64x128xbf16, #tpu.memory_space<vmem>>, vector<1x64x128xbf16>,
    return
  }
  func.func @transform_0(%arg0: i32) -> (i32, i32, i32) {
    %c0_i32 = arith.constant 0 : i32
    %c0_i32_0 = arith.constant 0 : i32
    %c0_i32_1 = arith.constant 0 : i32
    return %arg0, %c0_i32, %c0_i32_0 : i32, i32, i32
  }
  func.func @transform_1(%arg0: i32) -> (i32, i32, i32) {
    %c0_i32 = arith.constant 0 : i32
    %c0_i32_0 = arith.constant 0 : i32
    %c0_i32_1 = arith.constant 0 : i32
    %c0_i32_2 = arith.constant 0 : i32
    return %c0_i32, %c0_i32_0, %c0_i32_1 : i32, i32, i32
  }
  func.func @transform_2(%arg0: i32) -> (i32, i32) {
    %c0_i32 = arith.constant 0 : i32
    %c0_i32_0 = arith.constant 0 : i32
    %c0_i32_1 = arith.constant 0 : i32
    return %c0_i32, %c0_i32_0 : i32, i32
  }
  func.func @transform_3(%arg0: i32) -> (i32, i32, i32) {
    %c0_i32 = arith.constant 0 : i32
    %c0_i32_0 = arith.constant 0 : i32
    %c0_i32_1 = arith.constant 0 : i32
    return %arg0, %c0_i32, %c0_i32_0 : i32, i32, i32
  }
  func.func @transform_4(%arg0: i32) -> (i32, i32, i32) {
    %c0_i32 = arith.constant 0 : i32
    %c0_i32_0 = arith.constant 0 : i32
    %c0_i32_1 = arith.constant 0 : i32
    return %arg0, %c0_i32, %c0_i32_0 : i32, i32, i32
  }
}

</mosaic_0001>

<bundles_post_ra>
// kernel: basic_block_stack_forward.4
= control target key start
LH: loop header
LB: loop body
LE: loop exit
PB: predicated region body
PF: predicated region fallthrough
CT: control target
= control target key end

     0   :  { %s1233_s12 = smov 0   ;;  %s1389_s0 = inlined_call_operand.vmem [shape: bf16[128,576], index: 0, kind: input, shape index: {}]   ;;  %s1390_s1 = inlined_call_operand.vmem [shape: bf16[576,128], index: 1, kind: input, shape index: {}]   ;;  %s1391_s2 = inlined_call_operand.vmem [shape: f32[1,128], index: 2, kind: input, shape index: {}]   ;;  %s1392_s3 = inlined_call_operand.vmem [shape: bf16[128,128], index: 3, kind: output, shape index: {}]  }
   0x1 LB: > { %s909_s13 = sadd.s32 4294967295, %s1211_s12   ;;  %p913_p0 = scmp.ge.s32.totalorder %s1211_s12, 1  ;;  %s1211_s12 = sphi %s1233_s12, %s13_s12  }
   0x2   : > { %p139_p1 = scmp.lt.s32.totalorder %s1211_s12, 3 }
   0x4   : > { %p140_p2 = pnand %p913_p0, %p139_p1 }
   0x5   : > { %v1141_v0 = vld [vmem:[%s1390_s1 + $0x40] sm:$0xff] (!%p140_p2)   ;;  %v1145_v4 = vld [vmem:[%s1390_s1 + $0x48] sm:$0xff] (!%p140_p2)   ;;  %v1149_v8 = vld [vmem:[%s1390_s1 + $0x50] sm:$0xff] (!%p140_p2)   ;;  %s914_s19 = sshll.u32 (!%p140_p2), %s909_s13, 3  ;;  %vm597_vm0 = vcmask (!%p140_p2), 523264  }
   0x6   : > { %143 = sbr.rel (%p140_p2) target bundleno = 294 (0x126), region = 32  ;;  %v1142_v1 = vld [vmem:[%s1390_s1 + $0xc0] sm:$0xff] (!%p140_p2)   ;;  %1020 = vmatprep.subr.bf16.mxu0 (!%p140_p2), %v1141_v0  ;;  %v1146_v5 = vld [vmem:[%s1390_s1 + $0xc8] sm:$0xff] (!%p140_p2)   ;;  %v1150_v9 = vld [vmem:[%s1390_s1 + $0xd0] sm:$0xff] (!%p140_p2)   ;;  %p165_p3 = scmp.lt.s32.totalorder (!%p140_p2), %s914_s19, 15 }
   0x7   : > { %v1143_v2 = vld [vmem:[%s1390_s1] sm:$0xff] (!%p140_p2)   ;;  %1060 = vmatprep.subr.bf16.mxu1 (!%p140_p2), %v1142_v1  ;;  %v1147_v6 = vld [vmem:[%s1390_s1 + $0x8] sm:$0xff] (!%p140_p2)   ;;  %v1151_v10 = vld [vmem:[%s1390_s1 + $0x10] sm:$0xff] (!%p140_p2)  }
   0x8   : > { %v1144_v3 = vld [vmem:[%s1390_s1 + $0x80] sm:$0xff] (!%p140_p2)   ;;  %1021 = vmatpush3.bf16.msra.mxu0 (!%p140_p2), %v1143_v2  ;;  %v1148_v7 = vld [vmem:[%s1390_s1 + $0x88] sm:$0xff] (!%p140_p2)   ;;  %v1152_v11 = vld [vmem:[%s1390_s1 + $0x90] sm:$0xff] (!%p140_p2)  }
   0x9   : > { %1061 = vmatpush3.bf16.msra.mxu1 (!%p140_p2), %v1144_v3  ;;  %1022 = vmatprep.subr.bf16.mxu0 (!%p140_p2), %v1145_v4  ;;  %v1153_v12 = vld [vmem:[%s1390_s1 + $0x58] sm:$0xff] (!%p140_p2)   ;;  %v1157_v16 = vld [vmem:[%s1390_s1 + $0x60] sm:$0xff] (!%p140_p2)   ;;  %v1161_v20 = vld [vmem:[%s1390_s1 + $0x68] sm:$0xff] (!%p140_p2)  }
   0xa   : > { %1062 = vmatprep.subr.bf16.mxu1 (!%p140_p2), %v1146_v5  ;;  %v1154_v13 = vld [vmem:[%s1390_s1 + $0xd8] sm:$0xff] (!%p140_p2)   ;;  %v1158_v17 = vld [vmem:[%s1390_s1 + $0xe0] sm:$0xff] (!%p140_p2)   ;;  %v1162_v21 = vld [vmem:[%s1390_s1 + $0xe8] sm:$0xff] (!%p140_p2)  }
   0xb   : > { %v1155_v14 = vld [vmem:[%s1390_s1 + $0x18] sm:$0xff] (!%p140_p2)   ;;  %v1159_v18 = vld [vmem:[%s1390_s1 + $0x20] sm:$0xff] (!%p140_p2)   ;;  %v1163_v22 = vld [vmem:[%s1390_s1 + $0x28] sm:$0xff] (!%p140_p2)  }
   0xc   : > { %1023 = vmatpush3.bf16.msra.mxu0 (!%p140_p2), %v1147_v6  ;;  %v1156_v15 = vld [vmem:[%s1390_s1 + $0x98] sm:$0xff] (!%p140_p2)   ;;  %v1160_v19 = vld [vmem:[%s1390_s1 + $0xa0] sm:$0xff] (!%p140_p2)   ;;  %v1164_v23 = vld [vmem:[%s1390_s1 + $0xa8] sm:$0xff] (!%p140_p2)  }
   0xd   : > { %1063 = vmatpush3.bf16.msra.mxu1 %v1148_v7  ;;  %1024 = vmatprep.subr.bf16.mxu0 %v1149_v8  ;;  %s1394_s19 = smov (!%p165_p3, %s914_s19), 15  ;;  %v1165_v24 = vld [vmem:[%s1390_s1 + $0x70] sm:$0xff]   ;;  %v1169_v28 = vld [vmem:[%s1390_s1 + $0x78] sm:$0xff]   ;;  %v1179_v36 = vld [vmem:[%s1390_s1 + $0x100] sm:$0xff]  }
   0xe   : > { %1064 = vmatprep.subr.bf16.mxu1 %v1150_v9  ;;  %v1166_v25 = vld [vmem:[%s1390_s1 + $0xf0] sm:$0xff]   ;;  %s1132_s16 = smul.u32 20, %s1394_s19  ;;  %v1170_v29 = vld [vmem:[%s1390_s1 + $0xf8] sm:$0xff]   ;;  %v1186_v39 = vld [vmem:[%s1390_s1 + $0x108] sm:$0xff]   ;;  %s917_s17 = sshll.u32 %s1394_s19, 2 }
   0xf   : > { %v1167_v26 = vld [vmem:[%s1390_s1 + $0x30] sm:$0xff]   ;;  %v1171_v30 = vld [vmem:[%s1390_s1 + $0x38] sm:$0xff]   ;;  %v918_v58 = vld [vmem:[%s1391_s2] ss:$0 sm:$0xff]  ;;  %s175_s21 = scalar_lea.vmem %s1392_s3, %s917_s17 }
  0x10   : > { %1025 = vmatpush3.bf16.msra.mxu0 %v1151_v10  ;;  %v1168_v27 = vld [vmem:[%s1390_s1 + $0xb0] sm:$0xff]   ;;  %s1339_s13 = scalar_lea.vmem %s1389_s0, %s1132_s16  ;;  %v1172_v31 = vld [vmem:[%s1390_s1 + $0xb8] sm:$0xff]  }
  0x11   : > { %1065 = vmatpush3.bf16.msra.mxu1 %v1152_v11  ;;  %1026 = vmatprep.subr.bf16.mxu0 %v1153_v12  ;;  %v1173_v32 = vld [vmem:[%s1339_s13] ss:$20 sps:$4 sm:$0xff]   ;;  %v1175_v33 = vld [vmem:[%s1339_s13 + $0x4] ss:$20 sps:$4 sm:$0xff]   ;;  %v1176_v34 = vld [vmem:[%s1339_s13 + $0x8] ss:$20 sps:$4 sm:$0xff]  }
  0x12   : > { %1066 = vmatprep.subr.bf16.mxu1 %v1154_v13  ;;  %v1178_v35 = vld [vmem:[%s1339_s13 + $0xc] ss:$20 sps:$4 sm:$0xff]   ;;  %642 = vmatprep.mubr.bf16.mxu0 %v1175_v33  ;;  %v1182_v38 = vld [vmem:[%s1339_s13 + $0x34] ss:$20 sps:$4 sm:$0xff]   ;;  %v1185_v41 = vld [vmem:[%s1339_s13 + $0x30] ss:$20 sps:$4 sm:$0xff]  }
  0x13   : > { %707 = vmatprep.mubr.bf16.mxu1 %v1178_v35  ;;  %v1180_v37 = vld [vmem:[%s1339_s13 + $0x2c] ss:$20 sps:$4 sm:$0xff]   ;;  %v1184_v40 = vld [vmem:[%s1339_s13 + $0x28] ss:$20 sps:$4 sm:$0xff]   ;;  %v1193_v44 = vld [vmem:[%s1390_s1 + $0x110] sm:$0xff]  }
  0x14   : > { %1027 = vmatpush3.bf16.msra.mxu0 %v1155_v14  ;;  %v1187_v42 = vld [vmem:[%s1339_s13 + $0x54] ss:$20 sps:$4 sm:$0xff]   ;;  %v1189_v43 = vld [vmem:[%s1339_s13 + $0x5c] ss:$20 sps:$4 sm:$0xff]   ;;  %v1192_v47 = vld [vmem:[%s1339_s13 + $0x58] ss:$20 sps:$4 sm:$0xff]  }
  0x15   : > { %1067 = vmatpush3.bf16.msra.mxu1 %v1156_v15  ;;  %1028 = vmatprep.subr.bf16.mxu0 %v1157_v16  ;;  %v1200_v45 = vld [vmem:[%s1390_s1 + $0x118] sm:$0xff]   ;;  %v1191_v46 = vld [vmem:[%s1339_s13 + $0x50] ss:$20 sps:$4 sm:$0xff]   ;;  %v1199_v51 = vld [vmem:[%s1339_s13 + $0x80] ss:$20 sps:$4 sm:$0xff]  }
  0x16   : > { %1068 = vmatprep.subr.bf16.mxu1 %v1158_v17  ;;  %v1194_v48 = vld [vmem:[%s1339_s13 + $0x7c] ss:$20 sps:$4 sm:$0xff]   ;;  %v1196_v49 = vld [vmem:[%s1339_s13 + $0x84] ss:$20 sps:$4 sm:$0xff]   ;;  %v1202_v53 = vld [vmem:[%s1339_s13 + $0x60] ss:$20 sps:$4 sm:$0xff]  }
  0x17   : > { %v1198_v50 = vld [vmem:[%s1339_s13 + $0x78] ss:$20 sps:$4 sm:$0xff]   ;;  %v1201_v52 = vld [vmem:[%s1339_s13 + $0x10] ss:$20 sps:$4 sm:$0xff]   ;;  %v1204_v55 = vld [vmem:[%s1339_s13 + $0x88] ss:$20 sps:$4 sm:$0xff]  }
  0x18   : > { %1029 = vmatpush3.bf16.msra.mxu0 %v1159_v18  ;;  %v1203_v54 = vld [vmem:[%s1339_s13 + $0x38] ss:$20 sps:$4 sm:$0xff]  }
  0x19   : > { %1069 = vmatpush3.bf16.msra.mxu1 %v1160_v19  ;;  %1030 = vmatprep.subr.bf16.mxu0 %v1161_v20 }
  0x1a   : > { %1070 = vmatprep.subr.bf16.mxu1 %v1162_v21 }
  0x1c   : > { %1031 = vmatpush3.bf16.msra.mxu0 %v1163_v22 }
  0x1d   : > { %1071 = vmatpush3.bf16.msra.mxu1 %v1164_v23  ;;  %1032 = vmatprep.subr.bf16.mxu0 %v1165_v24 }
  0x1e   : > { %1072 = vmatprep.subr.bf16.mxu1 %v1166_v25 }
  0x20   : > { %1033 = vmatpush3.bf16.msra.mxu0 %v1167_v26 }
  0x21   : > { %1073 = vmatpush3.bf16.msra.mxu1 %v1168_v27  ;;  %1034 = vmatprep.subr.bf16.mxu0 %v1169_v28 }
  0x22   : > { %1074 = vmatprep.subr.bf16.mxu1 %v1170_v29 }
  0x24   : > { %1035 = vmatpush3.bf16.msra.mxu0 %v1171_v30 }
  0x25   : > { %1075 = vmatpush3.bf16.msra.mxu1 %v1172_v31  ;;  %1108 = vmatprep.subr.bf16.mxu0 %v1179_v36 }
  0x26   : > { %1124 = vmatprep.subr.bf16.mxu1 %v1179_v36 }
  0x27   : > { %643 = vmatmul.mubr.bf16.vlgmr.msra.gmra.mrb[0].mxu0 %v1173_v32 }
  0x28   : > { %708 = vmatmul.mubr.bf16.vlgmr.msra.gmra.mrb[0].mxu1 %v1176_v34  ;;  %1109 = vmatpush3.bf16.msra.mxu0 %v1179_v36 }
  0x29   : > { %1128 = vmatpush3.bf16.msra.mxu1 %v1179_v36  ;;  %650 = vmatprep.mubr.bf16.mxu0 %v1180_v37 }
  0x2a   : > { %715 = vmatprep.mubr.bf16.mxu1 %v1182_v38  ;;  %1110 = vmatprep.subr.bf16.mxu0 %v1186_v39 }
  0x2b   : > { %1125 = vmatprep.subr.bf16.mxu1 %v1186_v39 }
  0x2c   : > { %1111 = vmatpush3.bf16.msra.mxu0 %v1186_v39 }
  0x2d   : > { %1129 = vmatpush3.bf16.msra.mxu1 %v1186_v39  ;;  %1112 = vmatprep.subr.bf16.mxu0 %v1193_v44 }
  0x2e   : > { %1126 = vmatprep.subr.bf16.mxu1 %v1193_v44 }
  0x2f   : > { %651 = vmatmul.mubr.bf16.gmra.mrb[4].mxu0 %v1184_v40 }
  0x30   : > { %716 = vmatmul.mubr.bf16.gmra.mrb[4].mxu1 %v1185_v41  ;;  %658 = vmatprep.mubr.bf16.mxu0 %v1187_v42 }
  0x31   : > { %723 = vmatprep.mubr.bf16.mxu1 %v1189_v43  ;;  %1113 = vmatpush3.bf16.msra.mxu0 %v1193_v44 }
  0x32   : > { %1130 = vmatpush3.bf16.msra.mxu1 %v1193_v44  ;;  %1114 = vmatprep.subr.bf16.mxu0 %v1200_v45 }
  0x33   : > { %1127 = vmatprep.subr.bf16.mxu1 %v1200_v45 }
  0x35   : > { %1115 = vmatpush3.bf16.msra.mxu0 %v1200_v45 }
  0x36   : > { %1131 = vmatpush3.bf16.msra.mxu1 %v1200_v45 }
  0x37   : > { %659 = vmatmul.mubr.bf16.gmra.mrb[8].mxu0 %v1191_v46 }
  0x38   : > { %724 = vmatmul.mubr.bf16.gmra.mrb[8].mxu1 %v1192_v47  ;;  %666 = vmatprep.mubr.bf16.mxu0 %v1194_v48 }
  0x39   : > { %731 = vmatprep.mubr.bf16.mxu1 %v1196_v49 }
  0x3f   : > { %667 = vmatmul.mubr.bf16.gmra.mrb[12].mxu0 %v1198_v50 }
  0x40   : > { %732 = vmatmul.mubr.bf16.gmra.mrb[12].mxu1 %v1199_v51  ;;  %1116 = vmatprep.mubr.msk.bf16.mxu0 %vm597_vm0, %v1201_v52 }
  0x41   : > { %1120 = vmatprep.mubr.msk.bf16.mxu1 %vm597_vm0, %v1202_v53 }
  0x47   : > { %1117 = vmatmul.mubr.msk.bf16.vlgmr.msra.gmra.mrb[16].mxu0 %vm597_vm0, %v1203_v54 }
  0x48   : > { %1121 = vmatmul.mubr.msk.bf16.vlgmr.msra.gmra.mrb[16].mxu1 %vm597_vm0, %v1204_v55 }
  0xfa   : > { %v1036_v56 = vpop.f32.mrb[0].mxu0 }
  0xfb   : > { %v1076_v57 = vpop.f32.mrb[0].mxu1  ;;  %v1037_v59 = vpop.f32.mrb[1].mxu0 }
  0xfc   : > { %v1038_v60 = vadd.f32 %v1037_v59, %v1036_v56  ;;  %v1077_v61 = vpop.f32.mrb[1].mxu1  ;;  %v1039_v62 = vpop.f32.mrb[2].mxu0 }
  0xfd   : > { %v1078_v63 = vadd.f32 %v1077_v61, %v1076_v57  ;;  %v1079_v0 = vpop.f32.mrb[2].mxu1  ;;  %v1040_v1 = vpop.f32.mrb[3].mxu0 }
  0xfe   : > { %v645_v2 = vadd.f32 %v1038_v60, %v918_v58  ;;  %v1041_v3 = vadd.f32 %v1040_v1, %v1039_v62  ;;  %v1080_v4 = vpop.f32.mrb[3].mxu1 }
  0xff   : > { %v1081_v5 = vadd.f32 %v1080_v4, %v1079_v0 }
 0x100   : > { %v648_v6 = vadd.f32 %v1041_v3, %v918_v58  ;;  %v710_v7 = vadd.f32 %v1078_v63, %v645_v2 }
 0x102   : > { %v1042_v8 = vpop.f32.mrb[4].mxu0  ;;  %v713_v9 = vadd.f32 %v1081_v5, %v648_v6 }
 0x103   : > { %v1082_v10 = vpop.f32.mrb[4].mxu1  ;;  %v1043_v11 = vpop.f32.mrb[5].mxu0 }
 0x104   : > { %v1044_v12 = vadd.f32 %v1043_v11, %v1042_v8  ;;  %v1083_v13 = vpop.f32.mrb[5].mxu1  ;;  %v1045_v14 = vpop.f32.mrb[6].mxu0 }
 0x105   : > { %v1084_v15 = vadd.f32 %v1083_v13, %v1082_v10  ;;  %v1085_v16 = vpop.f32.mrb[6].mxu1  ;;  %v1046_v17 = vpop.f32.mrb[7].mxu0 }
 0x106   : > { %v653_v18 = vadd.f32 %v1044_v12, %v918_v58  ;;  %v1047_v19 = vadd.f32 %v1046_v17, %v1045_v14  ;;  %v1086_v20 = vpop.f32.mrb[7].mxu1 }
 0x107   : > { %v1087_v21 = vadd.f32 %v1086_v20, %v1085_v16 }
 0x108   : > { %v656_v22 = vadd.f32 %v1047_v19, %v918_v58  ;;  %v718_v23 = vadd.f32 %v1084_v15, %v653_v18 }
 0x10a   : > { %v1048_v24 = vpop.f32.mrb[8].mxu0  ;;  %v721_v25 = vadd.f32 %v1087_v21, %v656_v22 }
 0x10b   : > { %v1088_v26 = vpop.f32.mrb[8].mxu1  ;;  %v1049_v27 = vpop.f32.mrb[9].mxu0 }
 0x10c   : > { %v1050_v28 = vadd.f32 %v1049_v27, %v1048_v24  ;;  %v1089_v29 = vpop.f32.mrb[9].mxu1  ;;  %v1051_v30 = vpop.f32.mrb[10].mxu0 }
 0x10d   : > { %v1090_v31 = vadd.f32 %v1089_v29, %v1088_v26  ;;  %v1091_v32 = vpop.f32.mrb[10].mxu1  ;;  %v1052_v33 = vpop.f32.mrb[11].mxu0 }
 0x10e   : > { %v661_v34 = vadd.f32 %v1050_v28, %v918_v58  ;;  %v1053_v35 = vadd.f32 %v1052_v33, %v1051_v30  ;;  %v1092_v36 = vpop.f32.mrb[11].mxu1 }
 0x10f   : > { %v1093_v37 = vadd.f32 %v1092_v36, %v1091_v32 }
 0x110   : > { %v664_v38 = vadd.f32 %v1053_v35, %v918_v58  ;;  %v726_v39 = vadd.f32 %v1090_v31, %v661_v34 }
 0x112   : > { %v1054_v40 = vpop.f32.mrb[12].mxu0  ;;  %v729_v41 = vadd.f32 %v1093_v37, %v664_v38 }
 0x113   : > { %v1094_v42 = vpop.f32.mrb[12].mxu1  ;;  %v1055_v43 = vpop.f32.mrb[13].mxu0 }
 0x114   : > { %v1056_v44 = vadd.f32 %v1055_v43, %v1054_v40  ;;  %v1095_v45 = vpop.f32.mrb[13].mxu1  ;;  %v1057_v46 = vpop.f32.mrb[14].mxu0 }
 0x115   : > { %v1096_v47 = vadd.f32 %v1095_v45, %v1094_v42  ;;  %v1097_v48 = vpop.f32.mrb[14].mxu1  ;;  %v1058_v49 = vpop.f32.mrb[15].mxu0 }
 0x116   : > { %v669_v50 = vadd.f32 %v1056_v44, %v918_v58  ;;  %v1059_v51 = vadd.f32 %v1058_v49, %v1057_v46  ;;  %v1098_v52 = vpop.f32.mrb[15].mxu1 }
 0x117   : > { %v1099_v53 = vadd.f32 %v1098_v52, %v1097_v48 }
 0x118   : > { %v672_v54 = vadd.f32 %v1059_v51, %v918_v58  ;;  %v734_v55 = vadd.f32 %v1096_v47, %v669_v50 }
 0x11a   : > { %v1118_v56 = vpop.f32.mrb[16].mxu0  ;;  %v737_v57 = vadd.f32 %v1099_v53, %v672_v54 }
 0x11b   : > { %v783_v59 = vadd.f32 %v1118_v56, %v718_v23  ;;  %v1122_v60 = vpop.f32.mrb[16].mxu1  ;;  %v774_v61 = vpop.f32.mrb[17].mxu0 }
 0x11c   : > { %v799_v62 = vadd.f32 %v1122_v60, %v734_v55  ;;  %v775_v63 = vadd.f32 %v774_v61, %v710_v7  ;;  %v790_v0 = vpop.f32.mrb[17].mxu1  ;;  %v1119_v1 = vpop.f32.mrb[18].mxu0 }
 0x11d   : > { %v791_v2 = vadd.f32 %v790_v0, %v726_v39  ;;  %v786_v3 = vadd.f32 %v1119_v1, %v721_v25  ;;  %v1123_v4 = vpop.f32.mrb[18].mxu1  ;;  %v777_v5 = vpop.f32.mrb[19].mxu0  ;;  %v807_v11 = vmax.f32 %v783_v59, 0.0 }
 0x11e   : > { %v802_v6 = vadd.f32 %v1123_v4, %v737_v57  ;;  %v778_v8 = vadd.f32 %v777_v5, %v713_v9  ;;  %v793_v10 = vpop.f32.mrb[19].mxu1  ;;  %v811_v13 = vmax.f32 %v799_v62, 0.0  ;;  %v805_v14 = vmax.f32 %v775_v63, 0.0 }
 0x11f   : > { %v808_v58 = vmax.f32 %v786_v3, 0.0  ;;  %v794_v12 = vadd.f32 %v793_v10, %v729_v41  ;;  %v809_v16 = vmax.f32 %v791_v2, 0.0 }
 0x120   : > { %v812_v7 = vmax.f32 %v802_v6, 0.0  ;;  %v806_v15 = vmax.f32 %v778_v8, 0.0 }
 0x121   : > { %v1005_v17 = vpack.c.bf16 %v808_v58, %v807_v11  ;;  %v810_v18 = vmax.f32 %v794_v12, 0.0 }
 0x122   : > { %v1015_v19 = vpack.c.bf16 %v812_v7, %v811_v13  ;;  %v1000_v20 = vpack.c.bf16 %v806_v15, %v805_v14 }
 0x123   : > { %1017 = vst [vmem:[%s175_s21 + $0x8] sm:$0xff] %v1005_v17   ;;  %v1010_v21 = vpack.c.bf16 %v810_v18, %v809_v16 }
 0x124   : > { %1019 = vst [vmem:[%s175_s21 + $0x18] sm:$0xff] %v1015_v19   ;;  %1001 = vst [vmem:[%s175_s21] sm:$0xff] %v1000_v20  }
 0x125   : > { %1018 = vst [vmem:[%s175_s21 + $0x10] sm:$0xff] %v1010_v21  }
 0x126 PF: > { %s13_s12 = sadd.s32 1, %s1211_s12  }
 0x127   : > { %p10_p4 = scmp.ge.s32.totalorder %s13_s12, 4  }
 0x129   :  { %12 = sbr.rel (!%p10_p4) target bundleno = 1 (0x1), region = 62 }

// kernel: basic_block_stack_forward.5
= control target key start
LH: loop header
LB: loop body
LE: loop exit
PB: predicated region body
PF: predicated region fallthrough
CT: control target
= control target key end

     0   :  { %s2472_s21 = smov 0   ;;  %s2869_s0 = inlined_call_operand.vmem [shape: bf16[2,80,384], index: 0, kind: input, shape index: {}]   ;;  %s2870_s1 = inlined_call_operand.vmem [shape: bf16[3,384,128], index: 1, kind: input, shape index: {}]   ;;  %s2871_s2 = inlined_call_operand.vmem [shape: f32[1,128], index: 2, kind: input, shape index: {}]   ;;  %s2872_s3 = inlined_call_operand.vmem [shape: bf16[2,64,64], index: 3, kind: input, shape index: {}]   ;;  %s2873_s4 = inlined_call_operand.vmem [shape: bf16[64,128], index: 4, kind: input, shape index: {}]   ;;  %s2874_s5 = inlined_call_operand.vmem [shape: f32[1,128], index: 5, kind: input, shape index: {}]   ;;  %s2875_s6 = inlined_call_operand.vmem [shape: bf16[2,64,128], index: 6, kind: output, shape index: {}]  }
   0x1 LB: > { %s1723_s22 = sadd.s32 4294967295, %s2435_s21   ;;  %p1727_p0 = scmp.ge.s32.totalorder %s2435_s21, 1  ;;  %s2435_s21 = sphi %s2472_s21, %s16_s21  }
   0x2   : > { %p222_p1 = scmp.lt.s32.totalorder %s2435_s21, 3 }
   0x4   : > { %p223_p2 = pnand %p1727_p0, %p222_p1 }
   0x5   : > { %v2319_v0 = vld [vmem:[%s2870_s1 + $0x100] sm:$0xff] (!%p223_p2)   ;;  %v2322_v3 = vld [vmem:[%s2870_s1 + $0x108] sm:$0xff] (!%p223_p2)   ;;  %v2325_v6 = vld [vmem:[%s2870_s1 + $0x110] sm:$0xff] (!%p223_p2)   ;;  %p257_p3 = scmp.lt.s32.totalorder (!%p223_p2), %s1723_s22, 1  ;;  %vm1522_vm0 = vcmask (!%p223_p2), 523264  }
   0x6   : > { %226 = sbr.rel (%p223_p2) target bundleno = 357 (0x165), region = 44  ;;  %v2320_v1 = vld [vmem:[%s2870_s1 + $0x140] sm:$0xff] (!%p223_p2)   ;;  %1994 = vmatprep.subr.bf16.mxu0 (!%p223_p2), %v2319_v0  ;;  %v2323_v4 = vld [vmem:[%s2870_s1 + $0x148] sm:$0xff] (!%p223_p2)   ;;  %v2326_v7 = vld [vmem:[%s2870_s1 + $0x150] sm:$0xff] (!%p223_p2)  }
   0x7   : > { %v2321_v2 = vld [vmem:[%s2870_s1 + $0xc0] sm:$0xff] (!%p223_p2)   ;;  %2158 = vmatprep.subr.bf16.mxu1 (!%p223_p2), %v2320_v1  ;;  %v2324_v5 = vld [vmem:[%s2870_s1 + $0xc8] sm:$0xff] (!%p223_p2)   ;;  %v2327_v8 = vld [vmem:[%s2870_s1 + $0xd0] sm:$0xff] (!%p223_p2)  }
   0x8   : > { %1995 = vmatpush3.bf16.msra.mxu0 (!%p223_p2), %v2321_v2  ;;  %2159 = vmatpush3.bf16.msra.mxu1 (!%p223_p2), %v2320_v1  ;;  %v2328_v9 = vld [vmem:[%s2870_s1 + $0x118] sm:$0xff] (!%p223_p2)   ;;  %v2331_v12 = vld [vmem:[%s2870_s1 + $0x120] sm:$0xff] (!%p223_p2)   ;;  %v2334_v15 = vld [vmem:[%s2870_s1 + $0x128] sm:$0xff] (!%p223_p2)  }
   0x9   : > { %1996 = vmatprep.subr.bf16.mxu0 (!%p223_p2), %v2322_v3  ;;  %2160 = vmatprep.subr.bf16.mxu1 (!%p223_p2), %v2323_v4  ;;  %v2329_v10 = vld [vmem:[%s2870_s1 + $0x158] sm:$0xff] (!%p223_p2)   ;;  %v2332_v13 = vld [vmem:[%s2870_s1 + $0x160] sm:$0xff] (!%p223_p2)   ;;  %v2335_v16 = vld [vmem:[%s2870_s1 + $0x168] sm:$0xff] (!%p223_p2)  }
   0xa   : > { %v2330_v11 = vld [vmem:[%s2870_s1 + $0xd8] sm:$0xff] (!%p223_p2)   ;;  %v2333_v14 = vld [vmem:[%s2870_s1 + $0xe0] sm:$0xff] (!%p223_p2)   ;;  %v2336_v17 = vld [vmem:[%s2870_s1 + $0xe8] sm:$0xff] (!%p223_p2)  }
   0xb   : > { %v2337_v18 = vld [vmem:[%s2870_s1 + $0x130] sm:$0xff] (!%p223_p2)   ;;  %v2340_v21 = vld [vmem:[%s2870_s1 + $0x138] sm:$0xff] (!%p223_p2)   ;;  %v2348_v31 = vld [vmem:[%s2870_s1 + $0x40] sm:$0xff] (!%p223_p2)  }
   0xc   : > { %1997 = vmatpush3.bf16.msra.mxu0 (!%p223_p2), %v2324_v5  ;;  %2161 = vmatpush3.bf16.msra.mxu1 (!%p223_p2), %v2323_v4  ;;  %v2338_v19 = vld [vmem:[%s2870_s1 + $0x170] sm:$0xff] (!%p223_p2)   ;;  %v2341_v24 = vld [vmem:[%s2870_s1 + $0x178] sm:$0xff] (!%p223_p2)   ;;  %v2349_v33 = vld [vmem:[%s2870_s1 + $0x80] sm:$0xff] (!%p223_p2)  }
   0xd   : > { %1998 = vmatprep.subr.bf16.mxu0 %v2325_v6  ;;  %2162 = vmatprep.subr.bf16.mxu1 %v2326_v7  ;;  %s2877_s22 = smov (!%p257_p3, %s1723_s22), 1  ;;  %v2339_v20 = vld [vmem:[%s2870_s1 + $0xf0] sm:$0xff]   ;;  %v2342_v28 = vld [vmem:[%s2870_s1 + $0xf8] sm:$0xff]   ;;  %v2351_v36 = vld [vmem:[%s2870_s1] sm:$0xff]  }
   0xe   : > { %s2310_s11 = smul.u32 120, %s2877_s22  ;;  %v2352_v37 = vld [vmem:[%s2870_s1 + $0x48] sm:$0xff]   ;;  %v2357_v43 = vld [vmem:[%s2870_s1 + $0x50] sm:$0xff]   ;;  %v2360_v49 = vld [vmem:[%s2870_s1 + $0x58] sm:$0xff]   ;;  %s1961_s29 = sshll.u32 %s2877_s22, 5 }
   0xf   : > { %v2353_v40 = vld [vmem:[%s2870_s1 + $0x88] sm:$0xff]   ;;  %v2358_v44 = vld [vmem:[%s2870_s1 + $0x90] sm:$0xff]   ;;  %v2361_v50 = vld [vmem:[%s2870_s1 + $0x98] sm:$0xff]   ;;  %s2799_s14 = scalar_lea.vmem %s2872_s3, %s1961_s29  ;;  %s2858_s16 = scalar_lea.vmem %s2875_s6, %s1961_s29 }
  0x10   : > { %1999 = vmatpush3.bf16.msra.mxu0 %v2327_v8  ;;  %2163 = vmatpush3.bf16.msra.mxu1 %v2326_v7  ;;  %s2550_s20 = scalar_lea.vmem %s2869_s0, %s2310_s11  ;;  %v2354_v42 = vld [vmem:[%s2870_s1 + $0x8] sm:$0xff]   ;;  %v2359_v45 = vld [vmem:[%s2870_s1 + $0x10] sm:$0xff]   ;;  %v2362_v52 = vld [vmem:[%s2870_s1 + $0x18] sm:$0xff]  }
  0x11   : > { %2000 = vmatprep.subr.bf16.mxu0 %v2328_v9  ;;  %2164 = vmatprep.subr.bf16.mxu1 %v2329_v10  ;;  %v2559_v22 = vld [vmem:[%s2550_s20 + $0xc] sm:$0xff]  ;;  %v2562_v23 = vld [vmem:[%s2550_s20 + $0x18] sm:$0xff]  ;;  %v2570_v26 = vld [vmem:[%s2550_s20 + $0x14] sm:$0xf] }
  0x12   : > { %v1782_v25 = vcombine.high %v2559_v22, %v2562_v23  ;;  %v2573_v27 = vld [vmem:[%s2550_s20 + $0x20] sm:$0xf]  ;;  %v2579_v29 = vld [vmem:[%s2550_s20 + $0x2c] sm:$0xf]  ;;  %v2587_v32 = vld [vmem:[%s2550_s20 + $0x38] sm:$0xf]  ;;  %v1781_v34 = vcombine.low %v2559_v22, %v2562_v23 }
  0x13   : > { %v1783_v30 = vcombine.low %v2570_v26, %v2573_v27  ;;  %v1786_v35 = vcombine.low %v2579_v29, %v2587_v32  ;;  %v2603_v38 = vld [vmem:[%s2550_s20 + $0x24] sm:$0xff]  ;;  %v2606_v39 = vld [vmem:[%s2550_s20 + $0x30] sm:$0xff]  ;;  %v2628_v47 = vld [vmem:[%s2550_s20 + $0x3c] sm:$0xff] }
  0x14   : > { %2001 = vmatpush3.bf16.msra.mxu0 %v2330_v11  ;;  %2165 = vmatpush3.bf16.msra.mxu1 %v2329_v10  ;;  %v1785_v41 = vcombine.high %v2603_v38, %v2606_v39  ;;  %v1784_v46 = vcombine.low %v2603_v38, %v2606_v39  ;;  %v2631_v48 = vld [vmem:[%s2550_s20 + $0x48] sm:$0xff]  ;;  %v2365_v53 = vld [vmem:[%s2870_s1 + $0x60] sm:$0xff]   ;;  %v2655_v57 = vld [vmem:[%s2550_s20 + $0x54] sm:$0xff] }
  0x15   : > { %2002 = vmatprep.subr.bf16.mxu0 %v2331_v12  ;;  %2166 = vmatprep.subr.bf16.mxu1 %v2332_v13  ;;  %v1788_v51 = vcombine.high %v2628_v47, %v2631_v48  ;;  %v2366_v54 = vld [vmem:[%s2870_s1 + $0xa0] sm:$0xff]   ;;  %v274_v55 = vld [vmem:[%s2550_s20 + $0x8] sm:$0xf]  ;;  %v2661_v59 = vld [vmem:[%s2550_s20 + $0x50] sm:$0xf]  ;;  %v1787_v60 = vcombine.low %v2628_v47, %v2631_v48 }
  0x16   : > { %628 = vmatprep.mubr.bf16.mxu0 %v1782_v25  ;;  %2174 = vmatprep.mubr.bf16.mxu1 %v1783_v30  ;;  %v2367_v56 = vld [vmem:[%s2870_s1 + $0x20] sm:$0xff]   ;;  %v2368_v61 = vld [vmem:[%s2870_s1 + $0x68] sm:$0xff]   ;;  %v2677_v1 = vld [vmem:[%s2550_s20 + $0x5c] sm:$0xf]  ;;  %v1819_v5 = vcombine.low %v274_v55, %v2570_v26  ;;  %v2729_v25 = vcombine.high %v2562_v23, %v2603_v38 }
  0x17   : > { %v2658_v58 = vld [vmem:[%s2550_s20 + $0x44] sm:$0xf]  ;;  %v2369_v0 = vld [vmem:[%s2870_s1 + $0xa8] sm:$0xff]   ;;  %v2374_v7 = vld [vmem:[%s2870_s1 + $0x70] sm:$0xff]  }
  0x18   : > { %2003 = vmatpush3.bf16.msra.mxu0 %v2333_v14  ;;  %2167 = vmatpush3.bf16.msra.mxu1 %v2332_v13  ;;  %v2669_v62 = vld [vmem:[%s2550_s20 + $0x60] sm:$0xff]  ;;  %v1789_v63 = vcombine.low %v2658_v58, %v2661_v59  ;;  %v338_v2 = vld [vmem:[%s2550_s20 + $0x68] sm:$0xf]  ;;  %v2375_v8 = vld [vmem:[%s2870_s1 + $0xb0] sm:$0xff]  }
  0x19   : > { %2004 = vmatprep.subr.bf16.mxu0 %v2334_v15  ;;  %2168 = vmatprep.subr.bf16.mxu1 %v2335_v16  ;;  %v1791_v3 = vcombine.high %v2655_v57, %v2669_v62  ;;  %v1792_v4 = vcombine.low %v2677_v1, %v338_v2  ;;  %v2370_v6 = vld [vmem:[%s2870_s1 + $0x28] sm:$0xff]   ;;  %v2377_v9 = vld [vmem:[%s2870_s1 + $0x30] sm:$0xff]   ;;  %v1790_v10 = vcombine.low %v2655_v57, %v2669_v62  ;;  %v273_v11 = vld [vmem:[%s2550_s20] sm:$0xff] }
  0x1a   : > { %v2378_v12 = vld [vmem:[%s2870_s1 + $0x78] sm:$0xff]   ;;  %v1818_v14 = vcombine.high %v273_v11, %v2559_v22  ;;  %v2388_v26 = vld [vmem:[%s2870_s1 + $0x188] sm:$0xff]   ;;  %v2393_v30 = vld [vmem:[%s2870_s1 + $0x190] sm:$0xff]  }
  0x1b   : > { %v2379_v13 = vld [vmem:[%s2870_s1 + $0xb8] sm:$0xff]   ;;  %v2418_v55 = vld [vmem:[%s2873_s4 + $0x8] sm:$0xff]  }
  0x1c   : > { %2005 = vmatpush3.bf16.msra.mxu0 %v2336_v17  ;;  %2169 = vmatpush3.bf16.msra.mxu1 %v2335_v16  ;;  %v2380_v15 = vld [vmem:[%s2870_s1 + $0x38] sm:$0xff]   ;;  %v2383_v16 = vld [vmem:[%s2870_s1 + $0x1c0] sm:$0xff]  }
  0x1d   : > { %2006 = vmatprep.subr.bf16.mxu0 %v2337_v18  ;;  %2170 = vmatprep.subr.bf16.mxu1 %v2338_v19  ;;  %v2384_v17 = vld [vmem:[%s2870_s1 + $0x200] sm:$0xff]   ;;  %v1822_v18 = vcombine.low %v2573_v27, %v2579_v29  ;;  %v2391_v27 = vld [vmem:[%s2870_s1 + $0x1d0] sm:$0xff]   ;;  %v2745_v29 = vcombine.low %v2562_v23, %v2603_v38  ;;  %v2395_v23 = vld [vmem:[%s2870_s1 + $0x218] sm:$0xff]   ;;  %v1823_v38 = vcombine.low %v2606_v39, %v2628_v47 }
  0x20   : > { %2007 = vmatpush3.bf16.msra.mxu0 %v2339_v20  ;;  %2171 = vmatpush3.bf16.msra.mxu1 %v2338_v19  ;;  %v1817_v19 = vcombine.low %v273_v11, %v2559_v22  ;;  %v2385_v20 = vld [vmem:[%s2870_s1 + $0x180] sm:$0xff]   ;;  %v1825_v22 = vcombine.low %v2587_v32, %v2658_v58  ;;  %v2394_v32 = vld [vmem:[%s2870_s1 + $0x1d8] sm:$0xff]   ;;  %v2420_v58 = vld [vmem:[%s2550_s20 + $0x68] ss:$12 sps:$4 sm:$0xff]  }
  0x21   : > { %2008 = vmatprep.subr.bf16.mxu0 %v2340_v21  ;;  %2172 = vmatprep.subr.bf16.mxu1 %v2341_v24  ;;  %v2386_v21 = vld [vmem:[%s2870_s1 + $0x1c8] sm:$0xff]  }
  0x24   : > { %2009 = vmatpush3.bf16.msra.mxu0 %v2342_v28  ;;  %2173 = vmatpush3.bf16.msra.mxu1 %v2341_v24  ;;  %v2387_v24 = vld [vmem:[%s2870_s1 + $0x208] sm:$0xff]   ;;  %v2392_v28 = vld [vmem:[%s2870_s1 + $0x210] sm:$0xff]  }
  0x25   : > { %2046 = vmatprep.subr.bf16.mxu0 %v2348_v31  ;;  %2182 = vmatprep.subr.bf16.mxu1 %v2349_v33  ;;  %v1828_v31 = vcombine.low %v2661_v59, %v2677_v1  ;;  %v2422_v59 = vld [vmem:[%s2873_s4 + $0x18] sm:$0xff]  }
  0x26   : > { %v2428_v1 = vld [vmem:[%s2799_s14 + $0x18] sm:$0xff]  }
  0x27   : > { %629 = vmatmul.mubr.bf16.vlgmr.msra.gmra.mrb[0].mxu0 %v1781_v34  ;;  %2175 = vmatmul.mubr.bf16.vlgmr.msra.gmra.mrb[0].mxu1 %v1786_v35  ;;  %v2396_v34 = vld [vmem:[%s2870_s1 + $0x198] sm:$0xff]   ;;  %v2399_v35 = vld [vmem:[%s2870_s1 + $0x1e0] sm:$0xff]  }
  0x28   : > { %2047 = vmatpush3.bf16.msra.mxu0 %v2351_v36  ;;  %2183 = vmatpush3.bf16.msra.mxu1 %v2349_v33  ;;  %v1824_v33 = vcombine.high %v2606_v39, %v2628_v47  ;;  %v2400_v36 = vld [vmem:[%s2870_s1 + $0x220] sm:$0xff]   ;;  %v1827_v39 = vcombine.high %v2631_v48, %v2655_v57  ;;  %v1826_v47 = vcombine.low %v2631_v48, %v2655_v57  ;;  %v2414_v48 = vld [vmem:[%s2870_s1 + $0x1b8] sm:$0xff]   ;;  %v2421_v57 = vld [vmem:[%s2873_s4 + $0x10] sm:$0xff]  }
  0x29   : > { %2048 = vmatprep.subr.bf16.mxu0 %v2352_v37  ;;  %2184 = vmatprep.subr.bf16.mxu1 %v2353_v40  ;;  %v2415_v37 = vld [vmem:[%s2550_s20 + $0x20] ss:$12 sps:$4 sm:$0xff]  }
  0x2a   : > { %636 = vmatprep.mubr.bf16.mxu0 %v1785_v41  ;;  %2178 = vmatprep.mubr.bf16.mxu1 %v1789_v63  ;;  %v2402_v41 = vld [vmem:[%s2870_s1 + $0x1e8] sm:$0xff]  }
  0x2c   : > { %2049 = vmatpush3.bf16.msra.mxu0 %v2354_v42  ;;  %2185 = vmatpush3.bf16.msra.mxu1 %v2353_v40  ;;  %v2401_v40 = vld [vmem:[%s2870_s1 + $0x1a0] sm:$0xff]   ;;  %v2403_v42 = vld [vmem:[%s2870_s1 + $0x228] sm:$0xff]  }
  0x2d   : > { %2050 = vmatprep.subr.bf16.mxu0 %v2357_v43  ;;  %2186 = vmatprep.subr.bf16.mxu1 %v2358_v44  ;;  %v2404_v43 = vld [vmem:[%s2870_s1 + $0x1a8] sm:$0xff]  }
  0x2f   : > { %637 = vmatmul.mubr.bf16.gmra.mrb[4].mxu0 %v1784_v46  ;;  %2179 = vmatmul.mubr.bf16.gmra.mrb[4].mxu1 %v1792_v4  ;;  %v2411_v46 = vld [vmem:[%s2870_s1 + $0x1b0] sm:$0xff]  }
  0x30   : > { %2051 = vmatpush3.bf16.msra.mxu0 %v2359_v45  ;;  %2187 = vmatpush3.bf16.msra.mxu1 %v2358_v44  ;;  %v2409_v44 = vld [vmem:[%s2870_s1 + $0x1f0] sm:$0xff]  }
  0x31   : > { %2052 = vmatprep.subr.bf16.mxu0 %v2360_v49  ;;  %2188 = vmatprep.subr.bf16.mxu1 %v2361_v50  ;;  %v2410_v45 = vld [vmem:[%s2870_s1 + $0x230] sm:$0xff]   ;;  %v2412_v49 = vld [vmem:[%s2870_s1 + $0x1f8] sm:$0xff]  }
  0x32   : > { %644 = vmatprep.mubr.bf16.mxu0 %v1788_v51  ;;  %2198 = vmatprep.mubr.bf16.mxu1 %v1819_v5  ;;  %v2413_v51 = vld [vmem:[%s2870_s1 + $0x238] sm:$0xff]  }
  0x34   : > { %2053 = vmatpush3.bf16.msra.mxu0 %v2362_v52  ;;  %2189 = vmatpush3.bf16.msra.mxu1 %v2361_v50  ;;  %v1043_v50 = vld [vmem:[%s2550_s20 + $0x6c] sm:$0xff] }
  0x35   : > { %2054 = vmatprep.subr.bf16.mxu0 %v2365_v53  ;;  %2190 = vmatprep.subr.bf16.mxu1 %v2366_v54  ;;  %v1910_v52 = vcombine.low %v2669_v62, %v1043_v50  ;;  %v2417_v53 = vld [vmem:[%s2873_s4] sm:$0xff]   ;;  %v1911_v63 = vcombine.high %v2669_v62, %v1043_v50 }
  0x37   : > { %645 = vmatmul.mubr.bf16.gmra.mrb[8].mxu0 %v1787_v60  ;;  %v2423_v60 = vld [vmem:[%s2799_s14] sm:$0xff]  }
  0x38   : > { %2055 = vmatpush3.bf16.msra.mxu0 %v2367_v56  ;;  %2191 = vmatpush3.bf16.msra.mxu1 %v2366_v54  ;;  %v2416_v54 = vld [vmem:[%s2550_s20 + $0x38] ss:$12 sps:$4 sm:$0xff]   ;;  %v2419_v56 = vld [vmem:[%s2550_s20 + $0x50] ss:$12 sps:$4 sm:$0xff]  }
  0x39   : > { %2056 = vmatprep.subr.bf16.mxu0 %v2368_v61  ;;  %2192 = vmatprep.subr.bf16.mxu1 %v2369_v0  ;;  %v2424_v61 = vld [vmem:[%s2799_s14 + $0x8] sm:$0xff]  }
  0x3a   : > { %652 = vmatprep.mubr.bf16.mxu0 %v1791_v3 }
  0x3c   : > { %2057 = vmatpush3.bf16.msra.mxu0 %v2370_v6  ;;  %2193 = vmatpush3.bf16.msra.mxu1 %v2369_v0  ;;  %v2426_v0 = vld [vmem:[%s2799_s14 + $0x10] sm:$0xff]  }
  0x3d   : > { %2058 = vmatprep.subr.bf16.mxu0 %v2374_v7  ;;  %2194 = vmatprep.subr.bf16.mxu1 %v2375_v8 }
  0x3f   : > { %653 = vmatmul.mubr.bf16.gmra.mrb[12].mxu0 %v1790_v10 }
  0x40   : > { %2059 = vmatpush3.bf16.msra.mxu0 %v2377_v9  ;;  %2195 = vmatpush3.bf16.msra.mxu1 %v2375_v8 }
  0x41   : > { %2060 = vmatprep.subr.bf16.mxu0 %v2378_v12  ;;  %2196 = vmatprep.subr.bf16.mxu1 %v2379_v13 }
  0x42   : > { %931 = vmatprep.mubr.bf16.mxu0 %v1818_v14 }
  0x44   : > { %2061 = vmatpush3.bf16.msra.mxu0 %v2380_v15  ;;  %2197 = vmatpush3.bf16.msra.mxu1 %v2379_v13 }
  0x45   : > { %2098 = vmatprep.subr.bf16.mxu0 %v2383_v16  ;;  %2206 = vmatprep.subr.bf16.mxu1 %v2384_v17 }
  0x47   : > { %932 = vmatmul.mubr.bf16.vlgmr.msra.gmra.mrb[16].mxu0 %v1817_v19  ;;  %2199 = vmatmul.mubr.bf16.vlgmr.msra.gmra.mrb[0].mxu1 %v1822_v18 }
  0x48   : > { %2099 = vmatpush3.bf16.msra.mxu0 %v2385_v20  ;;  %2207 = vmatpush3.bf16.msra.mxu1 %v2384_v17 }
  0x49   : > { %2100 = vmatprep.subr.bf16.mxu0 %v2386_v21  ;;  %2208 = vmatprep.subr.bf16.mxu1 %v2387_v24 }
  0x4a   : > { %939 = vmatprep.mubr.bf16.mxu0 %v2729_v25  ;;  %2202 = vmatprep.mubr.bf16.mxu1 %v1825_v22 }
  0x4c   : > { %2101 = vmatpush3.bf16.msra.mxu0 %v2388_v26  ;;  %2209 = vmatpush3.bf16.msra.mxu1 %v2387_v24 }
  0x4d   : > { %2102 = vmatprep.subr.bf16.mxu0 %v2391_v27  ;;  %2210 = vmatprep.subr.bf16.mxu1 %v2392_v28 }
  0x4f   : > { %940 = vmatmul.mubr.bf16.gmra.mrb[20].mxu0 %v2745_v29  ;;  %2203 = vmatmul.mubr.bf16.gmra.mrb[4].mxu1 %v1828_v31 }
  0x50   : > { %2103 = vmatpush3.bf16.msra.mxu0 %v2393_v30  ;;  %2211 = vmatpush3.bf16.msra.mxu1 %v2392_v28 }
  0x51   : > { %2104 = vmatprep.subr.bf16.mxu0 %v2394_v32  ;;  %2212 = vmatprep.subr.bf16.mxu1 %v2395_v23 }
  0x52   : > { %947 = vmatprep.mubr.bf16.mxu0 %v1824_v33  ;;  %2222 = vmatprep.mubr.bf16.mxu1 %v2415_v37 }
  0x54   : > { %2105 = vmatpush3.bf16.msra.mxu0 %v2396_v34  ;;  %2213 = vmatpush3.bf16.msra.mxu1 %v2395_v23 }
  0x55   : > { %2106 = vmatprep.subr.bf16.mxu0 %v2399_v35  ;;  %2214 = vmatprep.subr.bf16.mxu1 %v2400_v36 }
  0x57   : > { %948 = vmatmul.mubr.bf16.gmra.mrb[24].mxu0 %v1823_v38 }
  0x58   : > { %2107 = vmatpush3.bf16.msra.mxu0 %v2401_v40  ;;  %2215 = vmatpush3.bf16.msra.mxu1 %v2400_v36 }
  0x59   : > { %2108 = vmatprep.subr.bf16.mxu0 %v2402_v41  ;;  %2216 = vmatprep.subr.bf16.mxu1 %v2403_v42 }
  0x5a   : > { %955 = vmatprep.mubr.bf16.mxu0 %v1827_v39 }
  0x5c   : > { %2109 = vmatpush3.bf16.msra.mxu0 %v2404_v43  ;;  %2217 = vmatpush3.bf16.msra.mxu1 %v2403_v42 }
  0x5d   : > { %2110 = vmatprep.subr.bf16.mxu0 %v2409_v44  ;;  %2218 = vmatprep.subr.bf16.mxu1 %v2410_v45 }
  0x5f   : > { %956 = vmatmul.mubr.bf16.gmra.mrb[28].mxu0 %v1826_v47 }
  0x60   : > { %2111 = vmatpush3.bf16.msra.mxu0 %v2411_v46  ;;  %2219 = vmatpush3.bf16.msra.mxu1 %v2410_v45 }
  0x61   : > { %2112 = vmatprep.subr.bf16.mxu0 %v2412_v49  ;;  %2220 = vmatprep.subr.bf16.mxu1 %v2413_v51 }
  0x62   : > { %1334 = vmatprep.mubr.bf16.mxu0 %v2729_v25 }
  0x64   : > { %2113 = vmatpush3.bf16.msra.mxu0 %v2414_v48  ;;  %2221 = vmatpush3.bf16.msra.mxu1 %v2413_v51 }
  0x65   : > { %2230 = vmatprep.subr.bf16.mxu1 %v2417_v53 }
  0x67   : > { %1335 = vmatmul.mubr.bf16.vlgmr.msra.gmra.mrb[32].mxu0 %v2745_v29  ;;  %2223 = vmatmul.mubr.bf16.vlgmr.msra.gmra.mrb[0].mxu1 %v2416_v54 }
  0x68   : > { %2231 = vmatpush3.bf16.msra.mxu1 %v2417_v53  ;;  %1342 = vmatprep.mubr.bf16.mxu0 %v1824_v33 }
  0x69   : > { %2232 = vmatprep.subr.bf16.mxu1 %v2418_v55  ;;  %2226 = vmatprep.mubr.bf16.mxu1 %v2419_v56 }
  0x6c   : > { %2233 = vmatpush3.bf16.msra.mxu1 %v2418_v55 }
  0x6d   : > { %2234 = vmatprep.subr.bf16.mxu1 %v2421_v57 }
  0x6f   : > { %1343 = vmatmul.mubr.bf16.gmra.mrb[36].mxu0 %v1823_v38  ;;  %2227 = vmatmul.mubr.bf16.gmra.mrb[4].mxu1 %v2420_v58 }
  0x70   : > { %2235 = vmatpush3.bf16.msra.mxu1 %v2421_v57  ;;  %1350 = vmatprep.mubr.bf16.mxu0 %v1827_v39 }
  0x71   : > { %2236 = vmatprep.subr.bf16.mxu1 %v2422_v59  ;;  %2238 = vmatprep.mubr.msk.bf16.mxu1 %vm1522_vm0, %v2423_v60 }
  0x74   : > { %2237 = vmatpush3.bf16.msra.mxu1 %v2422_v59 }
  0x77   : > { %1351 = vmatmul.mubr.bf16.gmra.mrb[40].mxu0 %v1826_v47  ;;  %2239 = vmatmul.mubr.msk.bf16.vlgmr.msra.gmra.mrb[0].mxu1 %vm1522_vm0, %v2424_v61 }
  0x78   : > { %1358 = vmatprep.mubr.bf16.mxu0 %v1911_v63  ;;  %2242 = vmatprep.mubr.msk.bf16.mxu1 %vm1522_vm0, %v2426_v0 }
  0x7f   : > { %1359 = vmatmul.mubr.bf16.gmra.mrb[44].mxu0 %v1910_v52  ;;  %2243 = vmatmul.mubr.msk.bf16.gmra.mrb[4].mxu1 %vm1522_vm0, %v2428_v1 }
  0xfa   : > { %v2010_v2 = vpop.f32.mrb[0].mxu0 }
  0xfb   : > { %v2011_v3 = vpop.f32.mrb[1].mxu0 }
  0xfc   : > { %v2012_v4 = vadd.f32 %v2011_v3, %v2010_v2  ;;  %v2013_v5 = vpop.f32.mrb[2].mxu0 }
  0xfd   : > { %v2014_v6 = vpop.f32.mrb[3].mxu0 }
  0xfe   : > { %v2015_v7 = vadd.f32 %v2014_v6, %v2013_v5 }
 0x102   : > { %v2016_v8 = vpop.f32.mrb[4].mxu0 }
 0x103   : > { %v2017_v9 = vpop.f32.mrb[5].mxu0 }
 0x104   : > { %v2018_v62 = vadd.f32 %v2017_v9, %v2016_v8  ;;  %v2019_v10 = vpop.f32.mrb[6].mxu0  ;;  %v1937_v9 = vld [vmem:[%s2871_s2] ss:$0 sm:$0xff] }
 0x105   : > { %v2020_v11 = vpop.f32.mrb[7].mxu0 }
 0x106   : > { %v2021_v12 = vadd.f32 %v2020_v11, %v2019_v10 }
 0x10a   : > { %v2022_v13 = vpop.f32.mrb[8].mxu0 }
 0x10b   : > { %v2023_v14 = vpop.f32.mrb[9].mxu0 }
 0x10c   : > { %v2024_v15 = vadd.f32 %v2023_v14, %v2022_v13  ;;  %v2025_v16 = vpop.f32.mrb[10].mxu0  ;;  %v1938_v14 = vld [vmem:[%s2874_s5] ss:$0 sm:$0xff] }
 0x10d   : > { %v2026_v17 = vpop.f32.mrb[11].mxu0 }
 0x10e   : > { %v2027_v18 = vadd.f32 %v2026_v17, %v2025_v16 }
 0x112   : > { %v2028_v19 = vpop.f32.mrb[12].mxu0 }
 0x113   : > { %v2029_v20 = vpop.f32.mrb[13].mxu0 }
 0x114   : > { %v2030_v21 = vadd.f32 %v2029_v20, %v2028_v19  ;;  %v2031_v24 = vpop.f32.mrb[14].mxu0 }
 0x115   : > { %v2032_v25 = vpop.f32.mrb[15].mxu0 }
 0x116   : > { %v2033_v22 = vadd.f32 %v2032_v25, %v2031_v24 }
 0x11a   : > { %v2062_v26 = vpop.f32.mrb[16].mxu0 }
 0x11b   : > { %v2063_v27 = vpop.f32.mrb[17].mxu0 }
 0x11c   : > { %v2064_v28 = vadd.f32 %v2063_v27, %v2062_v26  ;;  %v2065_v29 = vpop.f32.mrb[18].mxu0 }
 0x11d   : > { %v2066_v30 = vpop.f32.mrb[19].mxu0 }
 0x11e   : > { %v2251_v31 = vadd.f32 %v2064_v28, %v2012_v4  ;;  %v2067_v32 = vadd.f32 %v2066_v30, %v2065_v29 }
 0x120   : > { %v2261_v23 = vadd.f32 %v2067_v32, %v2015_v7 }
 0x122   : > { %v2068_v33 = vpop.f32.mrb[20].mxu0 }
 0x123   : > { %v2069_v34 = vpop.f32.mrb[21].mxu0 }
 0x124   : > { %v2070_v35 = vadd.f32 %v2069_v34, %v2068_v33  ;;  %v2071_v36 = vpop.f32.mrb[22].mxu0 }
 0x125   : > { %v2072_v37 = vpop.f32.mrb[23].mxu0 }
 0x126   : > { %v2246_v38 = vadd.f32 %v2070_v35, %v2018_v62  ;;  %v2073_v40 = vadd.f32 %v2072_v37, %v2071_v36 }
 0x128   : > { %v2256_v41 = vadd.f32 %v2073_v40, %v2021_v12 }
 0x12a   : > { %v2074_v42 = vpop.f32.mrb[24].mxu0 }
 0x12b   : > { %v2075_v39 = vpop.f32.mrb[25].mxu0 }
 0x12c   : > { %v2076_v43 = vadd.f32 %v2075_v39, %v2074_v42  ;;  %v2077_v44 = vpop.f32.mrb[26].mxu0 }
 0x12d   : > { %v2078_v45 = vpop.f32.mrb[27].mxu0 }
 0x12e   : > { %v2271_v46 = vadd.f32 %v2076_v43, %v2024_v15  ;;  %v2079_v47 = vadd.f32 %v2078_v45, %v2077_v44 }
 0x130   : > { %v2281_v49 = vadd.f32 %v2079_v47, %v2027_v18 }
 0x132   : > { %v2080_v50 = vpop.f32.mrb[28].mxu0 }
 0x133   : > { %v2081_v51 = vpop.f32.mrb[29].mxu0 }
 0x134   : > { %v2082_v52 = vadd.f32 %v2081_v51, %v2080_v50  ;;  %v2083_v48 = vpop.f32.mrb[30].mxu0 }
 0x135   : > { %v2084_v53 = vpop.f32.mrb[31].mxu0 }
 0x136   : > { %v2843_v54 = vadd.f32 %v2082_v52, %v2030_v21  ;;  %v2085_v55 = vadd.f32 %v2084_v53, %v2083_v48 }
 0x138   : > { %v2845_v56 = vadd.f32 %v2085_v55, %v2033_v22 }
 0x13a   : > { %v2114_v57 = vpop.f32.mrb[32].mxu0 }
 0x13b   : > { %v2115_v58 = vpop.f32.mrb[33].mxu0 }
 0x13c   : > { %v2116_v59 = vadd.f32 %v2115_v58, %v2114_v57  ;;  %v2117_v60 = vpop.f32.mrb[34].mxu0 }
 0x13d   : > { %v2118_v61 = vpop.f32.mrb[35].mxu0 }
 0x13e   : > { %v2252_v63 = vadd.f32 %v2251_v31, %v2116_v59  ;;  %v2119_v0 = vadd.f32 %v2118_v61, %v2117_v60 }
 0x140   : > { %v2262_v1 = vadd.f32 %v2261_v23, %v2119_v0  ;;  %v2253_v15 = vadd.f32 %v2252_v63, %v1937_v9 }
 0x142   : > { %v2120_v2 = vpop.f32.mrb[36].mxu0  ;;  %v2263_v11 = vadd.f32 %v2262_v1, %v1937_v9 }
 0x143   : > { %v2121_v3 = vpop.f32.mrb[37].mxu0 }
 0x144   : > { %v2122_v4 = vadd.f32 %v2121_v3, %v2120_v2  ;;  %v2123_v5 = vpop.f32.mrb[38].mxu0  ;;  %v2264_v29 = vadd.f32 %v2263_v11, %v1938_v14 }
 0x145   : > { %v2124_v6 = vpop.f32.mrb[39].mxu0 }
 0x146   : > { %v2247_v7 = vadd.f32 %v2246_v38, %v2122_v4  ;;  %v2125_v8 = vadd.f32 %v2124_v6, %v2123_v5 }
 0x148   : > { %v2257_v62 = vadd.f32 %v2256_v41, %v2125_v8  ;;  %v2248_v10 = vadd.f32 %v2247_v7, %v1937_v9 }
 0x14a   : > { %v2126_v12 = vpop.f32.mrb[40].mxu0  ;;  %v2240_v13 = vpop.f32.mrb[0].mxu1  ;;  %v2258_v16 = vadd.f32 %v2257_v62, %v1937_v9 }
 0x14b   : > { %v2249_v17 = vadd.f32 %v2248_v10, %v2240_v13  ;;  %v2127_v18 = vpop.f32.mrb[41].mxu0  ;;  %v1569_v19 = vpop.f32.mrb[1].mxu1 }
 0x14c   : > { %v2128_v20 = vadd.f32 %v2127_v18, %v2126_v12  ;;  %v2254_v21 = vadd.f32 %v2253_v15, %v1569_v19  ;;  %v2129_v24 = vpop.f32.mrb[42].mxu0  ;;  %v2241_v25 = vpop.f32.mrb[2].mxu1  ;;  %v2259_v22 = vadd.f32 %v2258_v16, %v1938_v14 }
 0x14d   : > { %v2250_v26 = vadd.f32 %v2249_v17, %v1938_v14  ;;  %v2130_v27 = vpop.f32.mrb[43].mxu0  ;;  %v1572_v28 = vpop.f32.mrb[3].mxu1 }
 0x14e   : > { %v2272_v30 = vadd.f32 %v2271_v46, %v2128_v20  ;;  %v2255_v31 = vadd.f32 %v2254_v21, %v1938_v14  ;;  %v2260_v32 = vadd.f32 %v2259_v22, %v2241_v25  ;;  %v2131_v23 = vadd.f32 %v2130_v27, %v2129_v24 }
 0x14f   : > { %v1610_v33 = vmax.f32 %v2250_v26, 0.0  ;;  %v2265_v34 = vadd.f32 %v2264_v29, %v1572_v28 }
 0x150   : > { %v1608_v35 = vmax.f32 %v2255_v31, 0.0  ;;  %v1611_v36 = vmax.f32 %v2260_v32, 0.0  ;;  %v2282_v37 = vadd.f32 %v2281_v49, %v2131_v23  ;;  %v2273_v38 = vadd.f32 %v2272_v30, %v1937_v9 }
 0x151   : > { %v1609_v40 = vmax.f32 %v2265_v34, 0.0 }
 0x152   : > { %v1979_v41 = vpack.c.bf16 %v1611_v36, %v1610_v33  ;;  %v2132_v42 = vpop.f32.mrb[44].mxu0  ;;  %v2244_v39 = vpop.f32.mrb[4].mxu1  ;;  %v2274_v43 = vadd.f32 %v2273_v38, %v1938_v14  ;;  %v2283_v44 = vadd.f32 %v2282_v37, %v1937_v9 }
 0x153   : > { %v1974_v45 = vpack.c.bf16 %v1609_v40, %v1608_v35  ;;  %v2133_v46 = vpop.f32.mrb[45].mxu0  ;;  %v1585_v47 = vpop.f32.mrb[5].mxu1 }
 0x154   : > { %1991 = vst [vmem:[%s2858_s16 + $0x8] sm:$0xff] %v1979_v41   ;;  %v2134_v49 = vadd.f32 %v2133_v46, %v2132_v42  ;;  %v2275_v50 = vadd.f32 %v2274_v43, %v1585_v47  ;;  %v2135_v51 = vpop.f32.mrb[46].mxu0  ;;  %v2245_v52 = vpop.f32.mrb[6].mxu1  ;;  %v2284_v48 = vadd.f32 %v2283_v44, %v1938_v14 }
 0x155   : > { %1975 = vst [vmem:[%s2858_s16] sm:$0xff] %v1974_v45   ;;  %v2136_v53 = vpop.f32.mrb[47].mxu0  ;;  %v1588_v55 = vpop.f32.mrb[7].mxu1 }
 0x156   : > { %v2267_v57 = vadd.f32 %v2843_v54, %v2134_v49  ;;  %v2137_v58 = vadd.f32 %v2136_v53, %v2135_v51  ;;  %v2285_v59 = vadd.f32 %v2284_v48, %v1588_v55  ;;  %v1612_v61 = vmax.f32 %v2275_v50, 0.0 }
 0x158   : > { %v2268_v60 = vadd.f32 %v2267_v57, %v1937_v9  ;;  %v2277_v63 = vadd.f32 %v2845_v56, %v2137_v58  ;;  %v1613_v0 = vmax.f32 %v2285_v59, 0.0 }
 0x15a   : > { %v2269_v1 = vadd.f32 %v2268_v60, %v1938_v14  ;;  %v2278_v2 = vadd.f32 %v2277_v63, %v1937_v9  ;;  %v1984_v3 = vpack.c.bf16 %v1613_v0, %v1612_v61 }
 0x15c   : > { %v2270_v4 = vadd.f32 %v2269_v1, %v2244_v39  ;;  %v2279_v5 = vadd.f32 %v2278_v2, %v1938_v14  ;;  %1992 = vst [vmem:[%s2858_s16 + $0x10] sm:$0xff] %v1984_v3  }
 0x15e   : > { %v2280_v6 = vadd.f32 %v2279_v5, %v2245_v52  ;;  %v1614_v7 = vmax.f32 %v2270_v4, 0.0 }
 0x160   : > { %v1615_v8 = vmax.f32 %v2280_v6, 0.0 }
 0x162   : > { %v1989_v62 = vpack.c.bf16 %v1615_v8, %v1614_v7 }
 0x164   : > { %1993 = vst [vmem:[%s2858_s16 + $0x18] sm:$0xff] %v1989_v62  }
 0x165 PF: > { %s16_s21 = sadd.s32 1, %s2435_s21  }
 0x166   : > { %p13_p4 = scmp.ge.s32.totalorder %s16_s21, 4  }
 0x168   :  { %15 = sbr.rel (!%p13_p4) target bundleno = 1 (0x1), region = 79 }

// kernel: basic_block_stack_forward.6
= control target key start
LH: loop header
LB: loop body
LE: loop exit
PB: predicated region body
PF: predicated region fallthrough
CT: control target
= control target key end

     0   :  { %s2119_s12 = smov 0   ;;  %s2480_s0 = inlined_call_operand.vmem [shape: bf16[2,80,384], index: 0, kind: input, shape index: {}]   ;;  %s2481_s1 = inlined_call_operand.vmem [shape: bf16[3,384,128], index: 1, kind: input, shape index: {}]   ;;  %s2482_s2 = inlined_call_operand.vmem [shape: f32[1,128], index: 2, kind: input, shape index: {}]   ;;  %s2483_s3 = inlined_call_operand.vmem [shape: bf16[2,64,128], index: 3, kind: output, shape index: {}]  }
   0x1 LB: > { %s1457_s13 = sadd.s32 4294967295, %s2097_s12   ;;  %p1461_p0 = scmp.ge.s32.totalorder %s2097_s12, 1  ;;  %s2097_s12 = sphi %s2119_s12, %s13_s12  }
   0x2   : > { %p137_p1 = scmp.lt.s32.totalorder %s2097_s12, 3 }
   0x4   : > { %p138_p2 = pnand %p1461_p0, %p137_p1 }
   0x5   : > { %v1989_v0 = vld [vmem:[%s2481_s1 + $0x100] sm:$0xff] (!%p138_p2)   ;;  %v1992_v3 = vld [vmem:[%s2481_s1 + $0x108] sm:$0xff] (!%p138_p2)   ;;  %v1995_v6 = vld [vmem:[%s2481_s1 + $0x110] sm:$0xff] (!%p138_p2)   ;;  %p161_p3 = scmp.lt.s32.totalorder (!%p138_p2), %s1457_s13, 1 }
   0x6   : > { %141 = sbr.rel (%p138_p2) target bundleno = 355 (0x163), region = 32  ;;  %v1990_v1 = vld [vmem:[%s2481_s1 + $0x140] sm:$0xff] (!%p138_p2)   ;;  %1712 = vmatprep.subr.bf16.mxu0 (!%p138_p2), %v1989_v0  ;;  %v1993_v4 = vld [vmem:[%s2481_s1 + $0x148] sm:$0xff] (!%p138_p2)   ;;  %v1996_v7 = vld [vmem:[%s2481_s1 + $0x150] sm:$0xff] (!%p138_p2)  }
   0x7   : > { %v1991_v2 = vld [vmem:[%s2481_s1 + $0xc0] sm:$0xff] (!%p138_p2)   ;;  %1868 = vmatprep.subr.bf16.mxu1 (!%p138_p2), %v1990_v1  ;;  %v1994_v5 = vld [vmem:[%s2481_s1 + $0xc8] sm:$0xff] (!%p138_p2)   ;;  %v1997_v8 = vld [vmem:[%s2481_s1 + $0xd0] sm:$0xff] (!%p138_p2)  }
   0x8   : > { %1713 = vmatpush3.bf16.msra.mxu0 (!%p138_p2), %v1991_v2  ;;  %1869 = vmatpush3.bf16.msra.mxu1 (!%p138_p2), %v1990_v1  ;;  %v1998_v9 = vld [vmem:[%s2481_s1 + $0x118] sm:$0xff] (!%p138_p2)   ;;  %v2001_v12 = vld [vmem:[%s2481_s1 + $0x120] sm:$0xff] (!%p138_p2)   ;;  %v2004_v15 = vld [vmem:[%s2481_s1 + $0x128] sm:$0xff] (!%p138_p2)  }
   0x9   : > { %1714 = vmatprep.subr.bf16.mxu0 (!%p138_p2), %v1992_v3  ;;  %1870 = vmatprep.subr.bf16.mxu1 (!%p138_p2), %v1993_v4  ;;  %v1999_v10 = vld [vmem:[%s2481_s1 + $0x158] sm:$0xff] (!%p138_p2)   ;;  %v2002_v13 = vld [vmem:[%s2481_s1 + $0x160] sm:$0xff] (!%p138_p2)   ;;  %v2005_v16 = vld [vmem:[%s2481_s1 + $0x168] sm:$0xff] (!%p138_p2)  }
   0xa   : > { %v2000_v11 = vld [vmem:[%s2481_s1 + $0xd8] sm:$0xff] (!%p138_p2)   ;;  %v2003_v14 = vld [vmem:[%s2481_s1 + $0xe0] sm:$0xff] (!%p138_p2)   ;;  %v2006_v17 = vld [vmem:[%s2481_s1 + $0xe8] sm:$0xff] (!%p138_p2)  }
   0xb   : > { %v2007_v18 = vld [vmem:[%s2481_s1 + $0x130] sm:$0xff] (!%p138_p2)   ;;  %v2010_v21 = vld [vmem:[%s2481_s1 + $0x138] sm:$0xff] (!%p138_p2)   ;;  %v2018_v31 = vld [vmem:[%s2481_s1 + $0x40] sm:$0xff] (!%p138_p2)  }
   0xc   : > { %1715 = vmatpush3.bf16.msra.mxu0 (!%p138_p2), %v1994_v5  ;;  %1871 = vmatpush3.bf16.msra.mxu1 (!%p138_p2), %v1993_v4  ;;  %v2008_v19 = vld [vmem:[%s2481_s1 + $0x170] sm:$0xff] (!%p138_p2)   ;;  %v2011_v24 = vld [vmem:[%s2481_s1 + $0x178] sm:$0xff] (!%p138_p2)   ;;  %v2019_v33 = vld [vmem:[%s2481_s1 + $0x80] sm:$0xff] (!%p138_p2)  }
   0xd   : > { %1716 = vmatprep.subr.bf16.mxu0 %v1995_v6  ;;  %1872 = vmatprep.subr.bf16.mxu1 %v1996_v7  ;;  %s2485_s13 = smov (!%p161_p3, %s1457_s13), 1  ;;  %v2009_v20 = vld [vmem:[%s2481_s1 + $0xf0] sm:$0xff]   ;;  %v2012_v28 = vld [vmem:[%s2481_s1 + $0xf8] sm:$0xff]   ;;  %v2021_v36 = vld [vmem:[%s2481_s1] sm:$0xff]  }
   0xe   : > { %s1980_s23 = smul.u32 120, %s2485_s13  ;;  %v2022_v37 = vld [vmem:[%s2481_s1 + $0x48] sm:$0xff]   ;;  %v2027_v43 = vld [vmem:[%s2481_s1 + $0x50] sm:$0xff]   ;;  %v2030_v49 = vld [vmem:[%s2481_s1 + $0x58] sm:$0xff]   ;;  %s1680_s17 = sshll.u32 %s2485_s13, 5 }
   0xf   : > { %v2023_v40 = vld [vmem:[%s2481_s1 + $0x88] sm:$0xff]   ;;  %v2028_v44 = vld [vmem:[%s2481_s1 + $0x90] sm:$0xff]   ;;  %v2031_v50 = vld [vmem:[%s2481_s1 + $0x98] sm:$0xff]   ;;  %s2469_s20 = scalar_lea.vmem %s2483_s3, %s1680_s17 }
  0x10   : > { %1717 = vmatpush3.bf16.msra.mxu0 %v1997_v8  ;;  %1873 = vmatpush3.bf16.msra.mxu1 %v1996_v7  ;;  %s2197_s5 = scalar_lea.vmem %s2480_s0, %s1980_s23  ;;  %v2024_v42 = vld [vmem:[%s2481_s1 + $0x8] sm:$0xff]   ;;  %v2029_v45 = vld [vmem:[%s2481_s1 + $0x10] sm:$0xff]   ;;  %v2032_v52 = vld [vmem:[%s2481_s1 + $0x18] sm:$0xff]  }
  0x11   : > { %1718 = vmatprep.subr.bf16.mxu0 %v1998_v9  ;;  %1874 = vmatprep.subr.bf16.mxu1 %v1999_v10  ;;  %v2206_v22 = vld [vmem:[%s2197_s5 + $0xc] sm:$0xff]  ;;  %v2209_v23 = vld [vmem:[%s2197_s5 + $0x18] sm:$0xff]  ;;  %v2217_v26 = vld [vmem:[%s2197_s5 + $0x14] sm:$0xf] }
  0x12   : > { %v1514_v25 = vcombine.high %v2206_v22, %v2209_v23  ;;  %v2220_v27 = vld [vmem:[%s2197_s5 + $0x20] sm:$0xf]  ;;  %v2226_v29 = vld [vmem:[%s2197_s5 + $0x2c] sm:$0xf]  ;;  %v2234_v32 = vld [vmem:[%s2197_s5 + $0x38] sm:$0xf]  ;;  %v1513_v34 = vcombine.low %v2206_v22, %v2209_v23 }
  0x13   : > { %v1515_v30 = vcombine.low %v2217_v26, %v2220_v27  ;;  %v1518_v35 = vcombine.low %v2226_v29, %v2234_v32  ;;  %v2250_v38 = vld [vmem:[%s2197_s5 + $0x24] sm:$0xff]  ;;  %v2253_v39 = vld [vmem:[%s2197_s5 + $0x30] sm:$0xff]  ;;  %v2275_v47 = vld [vmem:[%s2197_s5 + $0x3c] sm:$0xff] }
  0x14   : > { %1719 = vmatpush3.bf16.msra.mxu0 %v2000_v11  ;;  %1875 = vmatpush3.bf16.msra.mxu1 %v1999_v10  ;;  %v1517_v41 = vcombine.high %v2250_v38, %v2253_v39  ;;  %v1516_v46 = vcombine.low %v2250_v38, %v2253_v39  ;;  %v2278_v48 = vld [vmem:[%s2197_s5 + $0x48] sm:$0xff]  ;;  %v2035_v53 = vld [vmem:[%s2481_s1 + $0x60] sm:$0xff]   ;;  %v2302_v57 = vld [vmem:[%s2197_s5 + $0x54] sm:$0xff] }
  0x15   : > { %1720 = vmatprep.subr.bf16.mxu0 %v2001_v12  ;;  %1876 = vmatprep.subr.bf16.mxu1 %v2002_v13  ;;  %v1520_v51 = vcombine.high %v2275_v47, %v2278_v48  ;;  %v2036_v54 = vld [vmem:[%s2481_s1 + $0xa0] sm:$0xff]   ;;  %v173_v55 = vld [vmem:[%s2197_s5 + $0x8] sm:$0xf]  ;;  %v2308_v59 = vld [vmem:[%s2197_s5 + $0x50] sm:$0xf]  ;;  %v1519_v60 = vcombine.low %v2275_v47, %v2278_v48 }
  0x16   : > { %527 = vmatprep.mubr.bf16.mxu0 %v1514_v25  ;;  %1884 = vmatprep.mubr.bf16.mxu1 %v1515_v30  ;;  %v2037_v56 = vld [vmem:[%s2481_s1 + $0x20] sm:$0xff]   ;;  %v2038_v61 = vld [vmem:[%s2481_s1 + $0x68] sm:$0xff]   ;;  %v2324_v1 = vld [vmem:[%s2197_s5 + $0x5c] sm:$0xf]  ;;  %v1551_v5 = vcombine.low %v173_v55, %v2217_v26  ;;  %v2376_v25 = vcombine.high %v2209_v23, %v2250_v38 }
  0x17   : > { %v2305_v58 = vld [vmem:[%s2197_s5 + $0x44] sm:$0xf]  ;;  %v2039_v0 = vld [vmem:[%s2481_s1 + $0xa8] sm:$0xff]   ;;  %v2044_v7 = vld [vmem:[%s2481_s1 + $0x70] sm:$0xff]  }
  0x18   : > { %1721 = vmatpush3.bf16.msra.mxu0 %v2003_v14  ;;  %1877 = vmatpush3.bf16.msra.mxu1 %v2002_v13  ;;  %v2316_v62 = vld [vmem:[%s2197_s5 + $0x60] sm:$0xff]  ;;  %v1521_v63 = vcombine.low %v2305_v58, %v2308_v59  ;;  %v237_v2 = vld [vmem:[%s2197_s5 + $0x68] sm:$0xf]  ;;  %v2045_v8 = vld [vmem:[%s2481_s1 + $0xb0] sm:$0xff]  }
  0x19   : > { %1722 = vmatprep.subr.bf16.mxu0 %v2004_v15  ;;  %1878 = vmatprep.subr.bf16.mxu1 %v2005_v16  ;;  %v1523_v3 = vcombine.high %v2302_v57, %v2316_v62  ;;  %v1524_v4 = vcombine.low %v2324_v1, %v237_v2  ;;  %v2040_v6 = vld [vmem:[%s2481_s1 + $0x28] sm:$0xff]   ;;  %v2047_v9 = vld [vmem:[%s2481_s1 + $0x30] sm:$0xff]   ;;  %v1522_v10 = vcombine.low %v2302_v57, %v2316_v62  ;;  %v172_v11 = vld [vmem:[%s2197_s5] sm:$0xff] }
  0x1a   : > { %v2048_v12 = vld [vmem:[%s2481_s1 + $0x78] sm:$0xff]   ;;  %v1550_v14 = vcombine.high %v172_v11, %v2206_v22  ;;  %v2058_v26 = vld [vmem:[%s2481_s1 + $0x188] sm:$0xff]   ;;  %v2063_v30 = vld [vmem:[%s2481_s1 + $0x190] sm:$0xff]  }
  0x1b   : > { %v2049_v13 = vld [vmem:[%s2481_s1 + $0xb8] sm:$0xff]   ;;  %v2088_v55 = vld [vmem:[%s2197_s5 + $0x68] ss:$12 sps:$4 sm:$0xff]  }
  0x1c   : > { %1723 = vmatpush3.bf16.msra.mxu0 %v2006_v17  ;;  %1879 = vmatpush3.bf16.msra.mxu1 %v2005_v16  ;;  %v2050_v15 = vld [vmem:[%s2481_s1 + $0x38] sm:$0xff]   ;;  %v2053_v16 = vld [vmem:[%s2481_s1 + $0x1c0] sm:$0xff]  }
  0x1d   : > { %1724 = vmatprep.subr.bf16.mxu0 %v2007_v18  ;;  %1880 = vmatprep.subr.bf16.mxu1 %v2008_v19  ;;  %v2054_v17 = vld [vmem:[%s2481_s1 + $0x200] sm:$0xff]   ;;  %v1554_v18 = vcombine.low %v2220_v27, %v2226_v29  ;;  %v2061_v27 = vld [vmem:[%s2481_s1 + $0x1d0] sm:$0xff]   ;;  %v1552_v29 = vcombine.low %v2209_v23, %v2250_v38  ;;  %v2065_v23 = vld [vmem:[%s2481_s1 + $0x218] sm:$0xff]   ;;  %v1555_v38 = vcombine.low %v2253_v39, %v2275_v47 }
  0x20   : > { %1725 = vmatpush3.bf16.msra.mxu0 %v2009_v20  ;;  %1881 = vmatpush3.bf16.msra.mxu1 %v2008_v19  ;;  %v1549_v19 = vcombine.low %v172_v11, %v2206_v22  ;;  %v2055_v20 = vld [vmem:[%s2481_s1 + $0x180] sm:$0xff]   ;;  %v1557_v22 = vcombine.low %v2234_v32, %v2305_v58  ;;  %v2064_v32 = vld [vmem:[%s2481_s1 + $0x1d8] sm:$0xff]  }
  0x21   : > { %1726 = vmatprep.subr.bf16.mxu0 %v2010_v21  ;;  %1882 = vmatprep.subr.bf16.mxu1 %v2011_v24  ;;  %v2056_v21 = vld [vmem:[%s2481_s1 + $0x1c8] sm:$0xff]  }
  0x24   : > { %1727 = vmatpush3.bf16.msra.mxu0 %v2012_v28  ;;  %1883 = vmatpush3.bf16.msra.mxu1 %v2011_v24  ;;  %v2057_v24 = vld [vmem:[%s2481_s1 + $0x208] sm:$0xff]   ;;  %v2062_v28 = vld [vmem:[%s2481_s1 + $0x210] sm:$0xff]  }
  0x25   : > { %1764 = vmatprep.subr.bf16.mxu0 %v2018_v31  ;;  %1892 = vmatprep.subr.bf16.mxu1 %v2019_v33  ;;  %v1560_v31 = vcombine.low %v2308_v59, %v2324_v1 }
  0x27   : > { %528 = vmatmul.mubr.bf16.vlgmr.msra.gmra.mrb[0].mxu0 %v1513_v34  ;;  %1885 = vmatmul.mubr.bf16.vlgmr.msra.gmra.mrb[0].mxu1 %v1518_v35  ;;  %v2066_v34 = vld [vmem:[%s2481_s1 + $0x198] sm:$0xff]   ;;  %v2069_v35 = vld [vmem:[%s2481_s1 + $0x1e0] sm:$0xff]  }
  0x28   : > { %1765 = vmatpush3.bf16.msra.mxu0 %v2021_v36  ;;  %1893 = vmatpush3.bf16.msra.mxu1 %v2019_v33  ;;  %v1556_v33 = vcombine.high %v2253_v39, %v2275_v47  ;;  %v2070_v36 = vld [vmem:[%s2481_s1 + $0x220] sm:$0xff]   ;;  %v942_v39 = vld [vmem:[%s2197_s5 + $0x6c] sm:$0xff] }
  0x29   : > { %1766 = vmatprep.subr.bf16.mxu0 %v2022_v37  ;;  %1894 = vmatprep.subr.bf16.mxu1 %v2023_v40  ;;  %v2085_v37 = vld [vmem:[%s2197_s5 + $0x20] ss:$12 sps:$4 sm:$0xff]   ;;  %v2080_v47 = vld [vmem:[%s2481_s1 + $0x230] sm:$0xff]  }
  0x2a   : > { %535 = vmatprep.mubr.bf16.mxu0 %v1517_v41  ;;  %1888 = vmatprep.mubr.bf16.mxu1 %v1521_v63  ;;  %v2072_v41 = vld [vmem:[%s2481_s1 + $0x1e8] sm:$0xff]  }
  0x2c   : > { %1767 = vmatpush3.bf16.msra.mxu0 %v2024_v42  ;;  %1895 = vmatpush3.bf16.msra.mxu1 %v2023_v40  ;;  %v2071_v40 = vld [vmem:[%s2481_s1 + $0x1a0] sm:$0xff]   ;;  %v2073_v42 = vld [vmem:[%s2481_s1 + $0x228] sm:$0xff]  }
  0x2d   : > { %1768 = vmatprep.subr.bf16.mxu0 %v2027_v43  ;;  %1896 = vmatprep.subr.bf16.mxu1 %v2028_v44  ;;  %v1559_v43 = vcombine.high %v2278_v48, %v2302_v57 }
  0x2f   : > { %536 = vmatmul.mubr.bf16.gmra.mrb[4].mxu0 %v1516_v46  ;;  %1889 = vmatmul.mubr.bf16.gmra.mrb[4].mxu1 %v1524_v4  ;;  %v2079_v46 = vld [vmem:[%s2481_s1 + $0x1f0] sm:$0xff]  }
  0x30   : > { %1769 = vmatpush3.bf16.msra.mxu0 %v2029_v45  ;;  %1897 = vmatpush3.bf16.msra.mxu1 %v2028_v44  ;;  %v1642_v44 = vcombine.low %v2316_v62, %v942_v39  ;;  %v2074_v45 = vld [vmem:[%s2481_s1 + $0x1a8] sm:$0xff]  }
  0x31   : > { %1770 = vmatprep.subr.bf16.mxu0 %v2030_v49  ;;  %1898 = vmatprep.subr.bf16.mxu1 %v2031_v50  ;;  %v1558_v49 = vcombine.low %v2278_v48, %v2302_v57  ;;  %v2084_v48 = vld [vmem:[%s2481_s1 + $0x1b8] sm:$0xff]  }
  0x32   : > { %543 = vmatprep.mubr.bf16.mxu0 %v1520_v51  ;;  %1908 = vmatprep.mubr.bf16.mxu1 %v1551_v5  ;;  %v2082_v51 = vld [vmem:[%s2481_s1 + $0x1f8] sm:$0xff]  }
  0x34   : > { %1771 = vmatpush3.bf16.msra.mxu0 %v2032_v52  ;;  %1899 = vmatpush3.bf16.msra.mxu1 %v2031_v50  ;;  %v2081_v50 = vld [vmem:[%s2481_s1 + $0x1b0] sm:$0xff]   ;;  %v2083_v52 = vld [vmem:[%s2481_s1 + $0x238] sm:$0xff]  }
  0x35   : > { %1772 = vmatprep.subr.bf16.mxu0 %v2035_v53  ;;  %1900 = vmatprep.subr.bf16.mxu1 %v2036_v54  ;;  %v2086_v53 = vld [vmem:[%s2197_s5 + $0x38] ss:$12 sps:$4 sm:$0xff]  }
  0x37   : > { %544 = vmatmul.mubr.bf16.gmra.mrb[8].mxu0 %v1519_v60 }
  0x38   : > { %1773 = vmatpush3.bf16.msra.mxu0 %v2037_v56  ;;  %1901 = vmatpush3.bf16.msra.mxu1 %v2036_v54  ;;  %v2087_v54 = vld [vmem:[%s2197_s5 + $0x50] ss:$12 sps:$4 sm:$0xff]   ;;  %v1643_v56 = vcombine.high %v2316_v62, %v942_v39 }
  0x39   : > { %1774 = vmatprep.subr.bf16.mxu0 %v2038_v61  ;;  %1902 = vmatprep.subr.bf16.mxu1 %v2039_v0 }
  0x3a   : > { %551 = vmatprep.mubr.bf16.mxu0 %v1523_v3 }
  0x3c   : > { %1775 = vmatpush3.bf16.msra.mxu0 %v2040_v6  ;;  %1903 = vmatpush3.bf16.msra.mxu1 %v2039_v0 }
  0x3d   : > { %1776 = vmatprep.subr.bf16.mxu0 %v2044_v7  ;;  %1904 = vmatprep.subr.bf16.mxu1 %v2045_v8 }
  0x3f   : > { %552 = vmatmul.mubr.bf16.gmra.mrb[12].mxu0 %v1522_v10 }
  0x40   : > { %1777 = vmatpush3.bf16.msra.mxu0 %v2047_v9  ;;  %1905 = vmatpush3.bf16.msra.mxu1 %v2045_v8 }
  0x41   : > { %1778 = vmatprep.subr.bf16.mxu0 %v2048_v12  ;;  %1906 = vmatprep.subr.bf16.mxu1 %v2049_v13 }
  0x42   : > { %830 = vmatprep.mubr.bf16.mxu0 %v1550_v14 }
  0x44   : > { %1779 = vmatpush3.bf16.msra.mxu0 %v2050_v15  ;;  %1907 = vmatpush3.bf16.msra.mxu1 %v2049_v13 }
  0x45   : > { %1816 = vmatprep.subr.bf16.mxu0 %v2053_v16  ;;  %1916 = vmatprep.subr.bf16.mxu1 %v2054_v17 }
  0x47   : > { %831 = vmatmul.mubr.bf16.vlgmr.msra.gmra.mrb[16].mxu0 %v1549_v19  ;;  %1909 = vmatmul.mubr.bf16.vlgmr.msra.gmra.mrb[0].mxu1 %v1554_v18 }
  0x48   : > { %1817 = vmatpush3.bf16.msra.mxu0 %v2055_v20  ;;  %1917 = vmatpush3.bf16.msra.mxu1 %v2054_v17 }
  0x49   : > { %1818 = vmatprep.subr.bf16.mxu0 %v2056_v21  ;;  %1918 = vmatprep.subr.bf16.mxu1 %v2057_v24 }
  0x4a   : > { %838 = vmatprep.mubr.bf16.mxu0 %v2376_v25  ;;  %1912 = vmatprep.mubr.bf16.mxu1 %v1557_v22 }
  0x4c   : > { %1819 = vmatpush3.bf16.msra.mxu0 %v2058_v26  ;;  %1919 = vmatpush3.bf16.msra.mxu1 %v2057_v24 }
  0x4d   : > { %1820 = vmatprep.subr.bf16.mxu0 %v2061_v27  ;;  %1920 = vmatprep.subr.bf16.mxu1 %v2062_v28 }
  0x4f   : > { %839 = vmatmul.mubr.bf16.gmra.mrb[20].mxu0 %v1552_v29  ;;  %1913 = vmatmul.mubr.bf16.gmra.mrb[4].mxu1 %v1560_v31 }
  0x50   : > { %1821 = vmatpush3.bf16.msra.mxu0 %v2063_v30  ;;  %1921 = vmatpush3.bf16.msra.mxu1 %v2062_v28 }
  0x51   : > { %1822 = vmatprep.subr.bf16.mxu0 %v2064_v32  ;;  %1922 = vmatprep.subr.bf16.mxu1 %v2065_v23 }
  0x52   : > { %846 = vmatprep.mubr.bf16.mxu0 %v1556_v33  ;;  %1932 = vmatprep.mubr.bf16.mxu1 %v2085_v37 }
  0x54   : > { %1823 = vmatpush3.bf16.msra.mxu0 %v2066_v34  ;;  %1923 = vmatpush3.bf16.msra.mxu1 %v2065_v23 }
  0x55   : > { %1824 = vmatprep.subr.bf16.mxu0 %v2069_v35  ;;  %1924 = vmatprep.subr.bf16.mxu1 %v2070_v36 }
  0x57   : > { %847 = vmatmul.mubr.bf16.gmra.mrb[24].mxu0 %v1555_v38 }
  0x58   : > { %1825 = vmatpush3.bf16.msra.mxu0 %v2071_v40  ;;  %1925 = vmatpush3.bf16.msra.mxu1 %v2070_v36 }
  0x59   : > { %1826 = vmatprep.subr.bf16.mxu0 %v2072_v41  ;;  %1926 = vmatprep.subr.bf16.mxu1 %v2073_v42 }
  0x5a   : > { %854 = vmatprep.mubr.bf16.mxu0 %v1559_v43 }
  0x5c   : > { %1827 = vmatpush3.bf16.msra.mxu0 %v2074_v45  ;;  %1927 = vmatpush3.bf16.msra.mxu1 %v2073_v42 }
  0x5d   : > { %1828 = vmatprep.subr.bf16.mxu0 %v2079_v46  ;;  %1928 = vmatprep.subr.bf16.mxu1 %v2080_v47 }
  0x5f   : > { %855 = vmatmul.mubr.bf16.gmra.mrb[28].mxu0 %v1558_v49 }
  0x60   : > { %1829 = vmatpush3.bf16.msra.mxu0 %v2081_v50  ;;  %1929 = vmatpush3.bf16.msra.mxu1 %v2080_v47 }
  0x61   : > { %1830 = vmatprep.subr.bf16.mxu0 %v2082_v51  ;;  %1930 = vmatprep.subr.bf16.mxu1 %v2083_v52 }
  0x62   : > { %1233 = vmatprep.mubr.bf16.mxu0 %v2376_v25 }
  0x64   : > { %1831 = vmatpush3.bf16.msra.mxu0 %v2084_v48  ;;  %1931 = vmatpush3.bf16.msra.mxu1 %v2083_v52 }
  0x67   : > { %1234 = vmatmul.mubr.bf16.vlgmr.msra.gmra.mrb[32].mxu0 %v1552_v29  ;;  %1933 = vmatmul.mubr.bf16.vlgmr.msra.gmra.mrb[0].mxu1 %v2086_v53 }
  0x68   : > { %1241 = vmatprep.mubr.bf16.mxu0 %v1556_v33  ;;  %1936 = vmatprep.mubr.bf16.mxu1 %v2087_v54 }
  0x6f   : > { %1242 = vmatmul.mubr.bf16.gmra.mrb[36].mxu0 %v1555_v38  ;;  %1937 = vmatmul.mubr.bf16.gmra.mrb[4].mxu1 %v2088_v55 }
  0x70   : > { %1249 = vmatprep.mubr.bf16.mxu0 %v1559_v43 }
  0x77   : > { %1250 = vmatmul.mubr.bf16.gmra.mrb[40].mxu0 %v1558_v49 }
  0x78   : > { %1257 = vmatprep.mubr.bf16.mxu0 %v1643_v56 }
  0x7f   : > { %1258 = vmatmul.mubr.bf16.gmra.mrb[44].mxu0 %v1642_v44 }
  0xfa   : > { %v1728_v57 = vpop.f32.mrb[0].mxu0 }
  0xfb   : > { %v1729_v58 = vpop.f32.mrb[1].mxu0 }
  0xfc   : > { %v1730_v59 = vadd.f32 %v1729_v58, %v1728_v57  ;;  %v1731_v60 = vpop.f32.mrb[2].mxu0 }
  0xfd   : > { %v1732_v61 = vpop.f32.mrb[3].mxu0 }
  0xfe   : > { %v1733_v63 = vadd.f32 %v1732_v61, %v1731_v60  ;;  %v1669_v60 = vld [vmem:[%s2482_s2] ss:$0 sm:$0xff] }
 0x102   : > { %v1734_v0 = vpop.f32.mrb[4].mxu0 }
 0x103   : > { %v1735_v1 = vpop.f32.mrb[5].mxu0 }
 0x104   : > { %v1736_v2 = vadd.f32 %v1735_v1, %v1734_v0  ;;  %v1737_v3 = vpop.f32.mrb[6].mxu0 }
 0x105   : > { %v1738_v4 = vpop.f32.mrb[7].mxu0 }
 0x106   : > { %v1739_v5 = vadd.f32 %v1738_v4, %v1737_v3 }
 0x10a   : > { %v1740_v6 = vpop.f32.mrb[8].mxu0 }
 0x10b   : > { %v1741_v7 = vpop.f32.mrb[9].mxu0 }
 0x10c   : > { %v1742_v8 = vadd.f32 %v1741_v7, %v1740_v6  ;;  %v1743_v9 = vpop.f32.mrb[10].mxu0 }
 0x10d   : > { %v1744_v62 = vpop.f32.mrb[11].mxu0 }
 0x10e   : > { %v1745_v10 = vadd.f32 %v1744_v62, %v1743_v9 }
 0x112   : > { %v1746_v11 = vpop.f32.mrb[12].mxu0 }
 0x113   : > { %v1747_v12 = vpop.f32.mrb[13].mxu0 }
 0x114   : > { %v1748_v13 = vadd.f32 %v1747_v12, %v1746_v11  ;;  %v1749_v14 = vpop.f32.mrb[14].mxu0 }
 0x115   : > { %v1750_v15 = vpop.f32.mrb[15].mxu0 }
 0x116   : > { %v1751_v16 = vadd.f32 %v1750_v15, %v1749_v14 }
 0x11a   : > { %v1780_v17 = vpop.f32.mrb[16].mxu0 }
 0x11b   : > { %v1781_v18 = vpop.f32.mrb[17].mxu0 }
 0x11c   : > { %v1782_v19 = vadd.f32 %v1781_v18, %v1780_v17  ;;  %v1783_v20 = vpop.f32.mrb[18].mxu0 }
 0x11d   : > { %v1784_v21 = vpop.f32.mrb[19].mxu0 }
 0x11e   : > { %v1943_v24 = vadd.f32 %v1782_v19, %v1730_v59  ;;  %v1785_v25 = vadd.f32 %v1784_v21, %v1783_v20 }
 0x120   : > { %v1949_v22 = vadd.f32 %v1785_v25, %v1733_v63 }
 0x122   : > { %v1786_v26 = vpop.f32.mrb[20].mxu0 }
 0x123   : > { %v1787_v27 = vpop.f32.mrb[21].mxu0 }
 0x124   : > { %v1788_v28 = vadd.f32 %v1787_v27, %v1786_v26  ;;  %v1789_v29 = vpop.f32.mrb[22].mxu0 }
 0x125   : > { %v1790_v30 = vpop.f32.mrb[23].mxu0 }
 0x126   : > { %v1940_v31 = vadd.f32 %v1788_v28, %v1736_v2  ;;  %v1791_v32 = vadd.f32 %v1790_v30, %v1789_v29 }
 0x128   : > { %v1946_v23 = vadd.f32 %v1791_v32, %v1739_v5 }
 0x12a   : > { %v1792_v33 = vpop.f32.mrb[24].mxu0 }
 0x12b   : > { %v1793_v34 = vpop.f32.mrb[25].mxu0 }
 0x12c   : > { %v1794_v35 = vadd.f32 %v1793_v34, %v1792_v33  ;;  %v1795_v36 = vpop.f32.mrb[26].mxu0 }
 0x12d   : > { %v1796_v37 = vpop.f32.mrb[27].mxu0 }
 0x12e   : > { %v1955_v38 = vadd.f32 %v1794_v35, %v1742_v8  ;;  %v1797_v40 = vadd.f32 %v1796_v37, %v1795_v36 }
 0x130   : > { %v1961_v41 = vadd.f32 %v1797_v40, %v1745_v10 }
 0x132   : > { %v1798_v42 = vpop.f32.mrb[28].mxu0 }
 0x133   : > { %v1799_v43 = vpop.f32.mrb[29].mxu0 }
 0x134   : > { %v1800_v39 = vadd.f32 %v1799_v43, %v1798_v42  ;;  %v1801_v44 = vpop.f32.mrb[30].mxu0 }
 0x135   : > { %v1802_v45 = vpop.f32.mrb[31].mxu0 }
 0x136   : > { %v2458_v46 = vadd.f32 %v1800_v39, %v1748_v13  ;;  %v1803_v47 = vadd.f32 %v1802_v45, %v1801_v44 }
 0x138   : > { %v2460_v49 = vadd.f32 %v1803_v47, %v1751_v16 }
 0x13a   : > { %v1832_v50 = vpop.f32.mrb[32].mxu0  ;;  %v1934_v51 = vpop.f32.mrb[0].mxu1 }
 0x13b   : > { %v1833_v52 = vpop.f32.mrb[33].mxu0  ;;  %v1300_v48 = vpop.f32.mrb[1].mxu1 }
 0x13c   : > { %v1834_v53 = vadd.f32 %v1833_v52, %v1832_v50  ;;  %v1835_v54 = vpop.f32.mrb[34].mxu0  ;;  %v1935_v55 = vpop.f32.mrb[2].mxu1 }
 0x13d   : > { %v1836_v56 = vpop.f32.mrb[35].mxu0  ;;  %v1303_v57 = vpop.f32.mrb[3].mxu1 }
 0x13e   : > { %v1944_v58 = vadd.f32 %v1943_v24, %v1834_v53  ;;  %v1837_v59 = vadd.f32 %v1836_v56, %v1835_v54 }
 0x140   : > { %v1945_v61 = vadd.f32 %v1944_v58, %v1300_v48  ;;  %v1950_v63 = vadd.f32 %v1949_v22, %v1837_v59 }
 0x142   : > { %v1346_v0 = vadd.f32 %v1945_v61, %v1669_v60  ;;  %v1951_v1 = vadd.f32 %v1950_v63, %v1303_v57  ;;  %v1838_v2 = vpop.f32.mrb[36].mxu0  ;;  %v1938_v3 = vpop.f32.mrb[4].mxu1 }
 0x143   : > { %v1839_v4 = vpop.f32.mrb[37].mxu0  ;;  %v1316_v5 = vpop.f32.mrb[5].mxu1 }
 0x144   : > { %v1347_v6 = vadd.f32 %v1951_v1, %v1669_v60  ;;  %v1840_v7 = vadd.f32 %v1839_v4, %v1838_v2  ;;  %v1841_v8 = vpop.f32.mrb[38].mxu0  ;;  %v1939_v9 = vpop.f32.mrb[6].mxu1  ;;  %v1354_v11 = vmax.f32 %v1346_v0, 0.0 }
 0x145   : > { %v1842_v62 = vpop.f32.mrb[39].mxu0  ;;  %v1319_v10 = vpop.f32.mrb[7].mxu1 }
 0x146   : > { %v1355_v12 = vmax.f32 %v1347_v6, 0.0  ;;  %v1941_v13 = vadd.f32 %v1940_v31, %v1840_v7  ;;  %v1843_v14 = vadd.f32 %v1842_v62, %v1841_v8 }
 0x148   : > { %v1692_v15 = vpack.c.bf16 %v1355_v12, %v1354_v11  ;;  %v1942_v16 = vadd.f32 %v1941_v13, %v1934_v51  ;;  %v1947_v17 = vadd.f32 %v1946_v23, %v1843_v14 }
 0x14a   : > { %1693 = vst [vmem:[%s2469_s20] sm:$0xff] %v1692_v15   ;;  %v1348_v18 = vadd.f32 %v1942_v16, %v1669_v60  ;;  %v1948_v19 = vadd.f32 %v1947_v17, %v1935_v55  ;;  %v1844_v20 = vpop.f32.mrb[40].mxu0 }
 0x14b   : > { %v1845_v21 = vpop.f32.mrb[41].mxu0 }
 0x14c   : > { %v1349_v24 = vadd.f32 %v1948_v19, %v1669_v60  ;;  %v1846_v25 = vadd.f32 %v1845_v21, %v1844_v20  ;;  %v1847_v22 = vpop.f32.mrb[42].mxu0  ;;  %v1356_v27 = vmax.f32 %v1348_v18, 0.0 }
 0x14d   : > { %v1848_v26 = vpop.f32.mrb[43].mxu0 }
 0x14e   : > { %v1357_v28 = vmax.f32 %v1349_v24, 0.0  ;;  %v1956_v29 = vadd.f32 %v1955_v38, %v1846_v25  ;;  %v1849_v30 = vadd.f32 %v1848_v26, %v1847_v22 }
 0x150   : > { %v1697_v31 = vpack.c.bf16 %v1357_v28, %v1356_v27  ;;  %v1957_v32 = vadd.f32 %v1956_v29, %v1316_v5  ;;  %v1962_v33 = vadd.f32 %v1961_v41, %v1849_v30 }
 0x152   : > { %1709 = vst [vmem:[%s2469_s20 + $0x8] sm:$0xff] %v1697_v31   ;;  %v1350_v23 = vadd.f32 %v1957_v32, %v1669_v60  ;;  %v1963_v34 = vadd.f32 %v1962_v33, %v1319_v10  ;;  %v1850_v35 = vpop.f32.mrb[44].mxu0 }
 0x153   : > { %v1851_v36 = vpop.f32.mrb[45].mxu0 }
 0x154   : > { %v1351_v37 = vadd.f32 %v1963_v34, %v1669_v60  ;;  %v1852_v40 = vadd.f32 %v1851_v36, %v1850_v35  ;;  %v1853_v42 = vpop.f32.mrb[46].mxu0  ;;  %v1358_v39 = vmax.f32 %v1350_v23, 0.0 }
 0x155   : > { %v1854_v43 = vpop.f32.mrb[47].mxu0 }
 0x156   : > { %v1359_v44 = vmax.f32 %v1351_v37, 0.0  ;;  %v1953_v45 = vadd.f32 %v2458_v46, %v1852_v40  ;;  %v1855_v38 = vadd.f32 %v1854_v43, %v1853_v42 }
 0x158   : > { %v1702_v47 = vpack.c.bf16 %v1359_v44, %v1358_v39  ;;  %v1954_v50 = vadd.f32 %v1953_v45, %v1938_v3  ;;  %v1959_v41 = vadd.f32 %v2460_v49, %v1855_v38 }
 0x15a   : > { %1710 = vst [vmem:[%s2469_s20 + $0x10] sm:$0xff] %v1702_v47   ;;  %v1352_v51 = vadd.f32 %v1954_v50, %v1669_v60  ;;  %v1960_v52 = vadd.f32 %v1959_v41, %v1939_v9 }
 0x15c   : > { %v1353_v48 = vadd.f32 %v1960_v52, %v1669_v60  ;;  %v1360_v53 = vmax.f32 %v1352_v51, 0.0 }
 0x15e   : > { %v1361_v54 = vmax.f32 %v1353_v48, 0.0 }
 0x160   : > { %v1707_v55 = vpack.c.bf16 %v1361_v54, %v1360_v53 }
 0x162   : > { %1711 = vst [vmem:[%s2469_s20 + $0x18] sm:$0xff] %v1707_v55  }
 0x163 PF: > { %s13_s12 = sadd.s32 1, %s2097_s12  }
 0x164   : > { %p10_p4 = scmp.ge.s32.totalorder %s13_s12, 4  }
 0x166   :  { %12 = sbr.rel (!%p10_p4) target bundleno = 1 (0x1), region = 64 }

// kernel: basic_block_stack_forward.7
= control target key start
LH: loop header
LB: loop body
LE: loop exit
PB: predicated region body
PF: predicated region fallthrough
CT: control target
= control target key end

     0   :  { %s2229_s15 = smov 0   ;;  %s2619_s0 = inlined_call_operand.vmem [shape: bf16[2,80,384], index: 0, kind: input, shape index: {}]   ;;  %s2620_s1 = inlined_call_operand.vmem [shape: bf16[3,384,128], index: 1, kind: input, shape index: {}]   ;;  %s2621_s2 = inlined_call_operand.vmem [shape: f32[1,128], index: 2, kind: input, shape index: {}]   ;;  %s2622_s3 = inlined_call_operand.vmem [shape: bf16[2,64,128], index: 3, kind: input, shape index: {}]   ;;  %s2623_s4 = inlined_call_operand.vmem [shape: bf16[2,64,128], index: 4, kind: output, shape index: {}]  }
   0x1 LB: > { %s1540_s16 = sadd.s32 4294967295, %s2202_s15   ;;  %p1544_p0 = scmp.ge.s32.totalorder %s2202_s15, 1  ;;  %s2202_s15 = sphi %s2229_s15, %s14_s15  }
   0x2   : > { %p172_p1 = scmp.lt.s32.totalorder %s2202_s15, 3 }
   0x4   : > { %p173_p2 = pnand %p1544_p0, %p172_p1 }
   0x5   : > { %v2094_v0 = vld [vmem:[%s2620_s1 + $0x100] sm:$0xff] (!%p173_p2)   ;;  %v2097_v3 = vld [vmem:[%s2620_s1 + $0x108] sm:$0xff] (!%p173_p2)   ;;  %v2100_v6 = vld [vmem:[%s2620_s1 + $0x110] sm:$0xff] (!%p173_p2)   ;;  %p203_p3 = scmp.lt.s32.totalorder (!%p173_p2), %s1540_s16, 1 }
   0x6   : > { %176 = sbr.rel (%p173_p2) target bundleno = 357 (0x165), region = 36  ;;  %v2095_v1 = vld [vmem:[%s2620_s1 + $0x140] sm:$0xff] (!%p173_p2)   ;;  %1817 = vmatprep.subr.bf16.mxu0 (!%p173_p2), %v2094_v0  ;;  %v2098_v4 = vld [vmem:[%s2620_s1 + $0x148] sm:$0xff] (!%p173_p2)   ;;  %v2101_v7 = vld [vmem:[%s2620_s1 + $0x150] sm:$0xff] (!%p173_p2)  }
   0x7   : > { %v2096_v2 = vld [vmem:[%s2620_s1 + $0xc0] sm:$0xff] (!%p173_p2)   ;;  %1973 = vmatprep.subr.bf16.mxu1 (!%p173_p2), %v2095_v1  ;;  %v2099_v5 = vld [vmem:[%s2620_s1 + $0xc8] sm:$0xff] (!%p173_p2)   ;;  %v2102_v8 = vld [vmem:[%s2620_s1 + $0xd0] sm:$0xff] (!%p173_p2)  }
   0x8   : > { %1818 = vmatpush3.bf16.msra.mxu0 (!%p173_p2), %v2096_v2  ;;  %1974 = vmatpush3.bf16.msra.mxu1 (!%p173_p2), %v2095_v1  ;;  %v2103_v9 = vld [vmem:[%s2620_s1 + $0x118] sm:$0xff] (!%p173_p2)   ;;  %v2106_v12 = vld [vmem:[%s2620_s1 + $0x120] sm:$0xff] (!%p173_p2)   ;;  %v2109_v15 = vld [vmem:[%s2620_s1 + $0x128] sm:$0xff] (!%p173_p2)  }
   0x9   : > { %1819 = vmatprep.subr.bf16.mxu0 (!%p173_p2), %v2097_v3  ;;  %1975 = vmatprep.subr.bf16.mxu1 (!%p173_p2), %v2098_v4  ;;  %v2104_v10 = vld [vmem:[%s2620_s1 + $0x158] sm:$0xff] (!%p173_p2)   ;;  %v2107_v13 = vld [vmem:[%s2620_s1 + $0x160] sm:$0xff] (!%p173_p2)   ;;  %v2110_v16 = vld [vmem:[%s2620_s1 + $0x168] sm:$0xff] (!%p173_p2)  }
   0xa   : > { %v2105_v11 = vld [vmem:[%s2620_s1 + $0xd8] sm:$0xff] (!%p173_p2)   ;;  %v2108_v14 = vld [vmem:[%s2620_s1 + $0xe0] sm:$0xff] (!%p173_p2)   ;;  %v2111_v17 = vld [vmem:[%s2620_s1 + $0xe8] sm:$0xff] (!%p173_p2)  }
   0xb   : > { %v2112_v18 = vld [vmem:[%s2620_s1 + $0x130] sm:$0xff] (!%p173_p2)   ;;  %v2115_v21 = vld [vmem:[%s2620_s1 + $0x138] sm:$0xff] (!%p173_p2)   ;;  %v2123_v31 = vld [vmem:[%s2620_s1 + $0x40] sm:$0xff] (!%p173_p2)  }
   0xc   : > { %1820 = vmatpush3.bf16.msra.mxu0 (!%p173_p2), %v2099_v5  ;;  %1976 = vmatpush3.bf16.msra.mxu1 (!%p173_p2), %v2098_v4  ;;  %v2113_v19 = vld [vmem:[%s2620_s1 + $0x170] sm:$0xff] (!%p173_p2)   ;;  %v2116_v24 = vld [vmem:[%s2620_s1 + $0x178] sm:$0xff] (!%p173_p2)   ;;  %v2124_v33 = vld [vmem:[%s2620_s1 + $0x80] sm:$0xff] (!%p173_p2)  }
   0xd   : > { %1821 = vmatprep.subr.bf16.mxu0 %v2100_v6  ;;  %1977 = vmatprep.subr.bf16.mxu1 %v2101_v7  ;;  %s2625_s16 = smov (!%p203_p3, %s1540_s16), 1  ;;  %v2114_v20 = vld [vmem:[%s2620_s1 + $0xf0] sm:$0xff]   ;;  %v2117_v28 = vld [vmem:[%s2620_s1 + $0xf8] sm:$0xff]   ;;  %v2126_v36 = vld [vmem:[%s2620_s1] sm:$0xff]  }
   0xe   : > { %s2085_s27 = smul.u32 120, %s2625_s16  ;;  %v2127_v37 = vld [vmem:[%s2620_s1 + $0x48] sm:$0xff]   ;;  %v2132_v43 = vld [vmem:[%s2620_s1 + $0x50] sm:$0xff]   ;;  %v2135_v49 = vld [vmem:[%s2620_s1 + $0x58] sm:$0xff]  }
   0xf   : > { %v2128_v40 = vld [vmem:[%s2620_s1 + $0x88] sm:$0xff]   ;;  %v2133_v44 = vld [vmem:[%s2620_s1 + $0x90] sm:$0xff]   ;;  %v2136_v50 = vld [vmem:[%s2620_s1 + $0x98] sm:$0xff]  }
  0x10   : > { %1822 = vmatpush3.bf16.msra.mxu0 %v2102_v8  ;;  %1978 = vmatpush3.bf16.msra.mxu1 %v2101_v7  ;;  %s2307_s10 = scalar_lea.vmem %s2619_s0, %s2085_s27  ;;  %v2129_v42 = vld [vmem:[%s2620_s1 + $0x8] sm:$0xff]   ;;  %v2134_v45 = vld [vmem:[%s2620_s1 + $0x10] sm:$0xff]   ;;  %v2137_v52 = vld [vmem:[%s2620_s1 + $0x18] sm:$0xff]  }
  0x11   : > { %1823 = vmatprep.subr.bf16.mxu0 %v2103_v9  ;;  %1979 = vmatprep.subr.bf16.mxu1 %v2104_v10  ;;  %v2316_v22 = vld [vmem:[%s2307_s10 + $0xc] sm:$0xff]  ;;  %v2319_v23 = vld [vmem:[%s2307_s10 + $0x18] sm:$0xff]  ;;  %v2327_v26 = vld [vmem:[%s2307_s10 + $0x14] sm:$0xf] }
  0x12   : > { %v1599_v25 = vcombine.high %v2316_v22, %v2319_v23  ;;  %v2330_v27 = vld [vmem:[%s2307_s10 + $0x20] sm:$0xf]  ;;  %v2336_v29 = vld [vmem:[%s2307_s10 + $0x2c] sm:$0xf]  ;;  %v2344_v32 = vld [vmem:[%s2307_s10 + $0x38] sm:$0xf]  ;;  %v1598_v34 = vcombine.low %v2316_v22, %v2319_v23 }
  0x13   : > { %v1600_v30 = vcombine.low %v2327_v26, %v2330_v27  ;;  %v1603_v35 = vcombine.low %v2336_v29, %v2344_v32  ;;  %v2360_v38 = vld [vmem:[%s2307_s10 + $0x24] sm:$0xff]  ;;  %v2363_v39 = vld [vmem:[%s2307_s10 + $0x30] sm:$0xff]  ;;  %v2385_v47 = vld [vmem:[%s2307_s10 + $0x3c] sm:$0xff] }
  0x14   : > { %1824 = vmatpush3.bf16.msra.mxu0 %v2105_v11  ;;  %1980 = vmatpush3.bf16.msra.mxu1 %v2104_v10  ;;  %v1602_v41 = vcombine.high %v2360_v38, %v2363_v39  ;;  %v1601_v46 = vcombine.low %v2360_v38, %v2363_v39  ;;  %v2388_v48 = vld [vmem:[%s2307_s10 + $0x48] sm:$0xff]  ;;  %v2140_v53 = vld [vmem:[%s2620_s1 + $0x60] sm:$0xff]   ;;  %v2412_v57 = vld [vmem:[%s2307_s10 + $0x54] sm:$0xff] }
  0x15   : > { %1825 = vmatprep.subr.bf16.mxu0 %v2106_v12  ;;  %1981 = vmatprep.subr.bf16.mxu1 %v2107_v13  ;;  %v1605_v51 = vcombine.high %v2385_v47, %v2388_v48  ;;  %v2141_v54 = vld [vmem:[%s2620_s1 + $0xa0] sm:$0xff]   ;;  %v220_v55 = vld [vmem:[%s2307_s10 + $0x8] sm:$0xf]  ;;  %v2418_v59 = vld [vmem:[%s2307_s10 + $0x50] sm:$0xf]  ;;  %v1604_v60 = vcombine.low %v2385_v47, %v2388_v48 }
  0x16   : > { %574 = vmatprep.mubr.bf16.mxu0 %v1599_v25  ;;  %1989 = vmatprep.mubr.bf16.mxu1 %v1600_v30  ;;  %v2142_v56 = vld [vmem:[%s2620_s1 + $0x20] sm:$0xff]   ;;  %v2143_v61 = vld [vmem:[%s2620_s1 + $0x68] sm:$0xff]   ;;  %v2434_v1 = vld [vmem:[%s2307_s10 + $0x5c] sm:$0xf]  ;;  %v1636_v5 = vcombine.low %v220_v55, %v2327_v26  ;;  %v2486_v25 = vcombine.high %v2319_v23, %v2360_v38 }
  0x17   : > { %v2415_v58 = vld [vmem:[%s2307_s10 + $0x44] sm:$0xf]  ;;  %v2144_v0 = vld [vmem:[%s2620_s1 + $0xa8] sm:$0xff]   ;;  %v2149_v7 = vld [vmem:[%s2620_s1 + $0x70] sm:$0xff]  }
  0x18   : > { %1826 = vmatpush3.bf16.msra.mxu0 %v2108_v14  ;;  %1982 = vmatpush3.bf16.msra.mxu1 %v2107_v13  ;;  %v2426_v62 = vld [vmem:[%s2307_s10 + $0x60] sm:$0xff]  ;;  %v1606_v63 = vcombine.low %v2415_v58, %v2418_v59  ;;  %v284_v2 = vld [vmem:[%s2307_s10 + $0x68] sm:$0xf]  ;;  %v2150_v8 = vld [vmem:[%s2620_s1 + $0xb0] sm:$0xff]  }
  0x19   : > { %1827 = vmatprep.subr.bf16.mxu0 %v2109_v15  ;;  %1983 = vmatprep.subr.bf16.mxu1 %v2110_v16  ;;  %v1608_v3 = vcombine.high %v2412_v57, %v2426_v62  ;;  %v1609_v4 = vcombine.low %v2434_v1, %v284_v2  ;;  %v2145_v6 = vld [vmem:[%s2620_s1 + $0x28] sm:$0xff]   ;;  %v2152_v9 = vld [vmem:[%s2620_s1 + $0x30] sm:$0xff]   ;;  %v1607_v10 = vcombine.low %v2412_v57, %v2426_v62  ;;  %v219_v11 = vld [vmem:[%s2307_s10] sm:$0xff] }
  0x1a   : > { %v2153_v12 = vld [vmem:[%s2620_s1 + $0x78] sm:$0xff]   ;;  %v1635_v14 = vcombine.high %v219_v11, %v2316_v22  ;;  %v2163_v26 = vld [vmem:[%s2620_s1 + $0x188] sm:$0xff]   ;;  %v2168_v30 = vld [vmem:[%s2620_s1 + $0x190] sm:$0xff]  }
  0x1b   : > { %v2154_v13 = vld [vmem:[%s2620_s1 + $0xb8] sm:$0xff]   ;;  %v2193_v55 = vld [vmem:[%s2307_s10 + $0x68] ss:$12 sps:$4 sm:$0xff]  }
  0x1c   : > { %1828 = vmatpush3.bf16.msra.mxu0 %v2111_v17  ;;  %1984 = vmatpush3.bf16.msra.mxu1 %v2110_v16  ;;  %v2155_v15 = vld [vmem:[%s2620_s1 + $0x38] sm:$0xff]   ;;  %v2158_v16 = vld [vmem:[%s2620_s1 + $0x1c0] sm:$0xff]  }
  0x1d   : > { %1829 = vmatprep.subr.bf16.mxu0 %v2112_v18  ;;  %1985 = vmatprep.subr.bf16.mxu1 %v2113_v19  ;;  %v2159_v17 = vld [vmem:[%s2620_s1 + $0x200] sm:$0xff]   ;;  %v1639_v18 = vcombine.low %v2330_v27, %v2336_v29  ;;  %v2166_v27 = vld [vmem:[%s2620_s1 + $0x1d0] sm:$0xff]   ;;  %v1637_v29 = vcombine.low %v2319_v23, %v2360_v38  ;;  %v2170_v23 = vld [vmem:[%s2620_s1 + $0x218] sm:$0xff]   ;;  %v1640_v38 = vcombine.low %v2363_v39, %v2385_v47 }
  0x20   : > { %1830 = vmatpush3.bf16.msra.mxu0 %v2114_v20  ;;  %1986 = vmatpush3.bf16.msra.mxu1 %v2113_v19  ;;  %v1634_v19 = vcombine.low %v219_v11, %v2316_v22  ;;  %v2160_v20 = vld [vmem:[%s2620_s1 + $0x180] sm:$0xff]   ;;  %v1642_v22 = vcombine.low %v2344_v32, %v2415_v58  ;;  %v2169_v32 = vld [vmem:[%s2620_s1 + $0x1d8] sm:$0xff]  }
  0x21   : > { %1831 = vmatprep.subr.bf16.mxu0 %v2115_v21  ;;  %1987 = vmatprep.subr.bf16.mxu1 %v2116_v24  ;;  %v2161_v21 = vld [vmem:[%s2620_s1 + $0x1c8] sm:$0xff]  }
  0x24   : > { %1832 = vmatpush3.bf16.msra.mxu0 %v2117_v28  ;;  %1988 = vmatpush3.bf16.msra.mxu1 %v2116_v24  ;;  %v2162_v24 = vld [vmem:[%s2620_s1 + $0x208] sm:$0xff]   ;;  %v2167_v28 = vld [vmem:[%s2620_s1 + $0x210] sm:$0xff]  }
  0x25   : > { %1869 = vmatprep.subr.bf16.mxu0 %v2123_v31  ;;  %1997 = vmatprep.subr.bf16.mxu1 %v2124_v33  ;;  %v1645_v31 = vcombine.low %v2418_v59, %v2434_v1 }
  0x27   : > { %575 = vmatmul.mubr.bf16.vlgmr.msra.gmra.mrb[0].mxu0 %v1598_v34  ;;  %1990 = vmatmul.mubr.bf16.vlgmr.msra.gmra.mrb[0].mxu1 %v1603_v35  ;;  %v2171_v34 = vld [vmem:[%s2620_s1 + $0x198] sm:$0xff]   ;;  %v2174_v35 = vld [vmem:[%s2620_s1 + $0x1e0] sm:$0xff]  }
  0x28   : > { %1870 = vmatpush3.bf16.msra.mxu0 %v2126_v36  ;;  %1998 = vmatpush3.bf16.msra.mxu1 %v2124_v33  ;;  %v1641_v33 = vcombine.high %v2363_v39, %v2385_v47  ;;  %v2175_v36 = vld [vmem:[%s2620_s1 + $0x220] sm:$0xff]   ;;  %v989_v39 = vld [vmem:[%s2307_s10 + $0x6c] sm:$0xff] }
  0x29   : > { %1871 = vmatprep.subr.bf16.mxu0 %v2127_v37  ;;  %1999 = vmatprep.subr.bf16.mxu1 %v2128_v40  ;;  %v2190_v37 = vld [vmem:[%s2307_s10 + $0x20] ss:$12 sps:$4 sm:$0xff]   ;;  %v2185_v47 = vld [vmem:[%s2620_s1 + $0x230] sm:$0xff]  }
  0x2a   : > { %582 = vmatprep.mubr.bf16.mxu0 %v1602_v41  ;;  %1993 = vmatprep.mubr.bf16.mxu1 %v1606_v63  ;;  %v2177_v41 = vld [vmem:[%s2620_s1 + $0x1e8] sm:$0xff]  }
  0x2c   : > { %1872 = vmatpush3.bf16.msra.mxu0 %v2129_v42  ;;  %2000 = vmatpush3.bf16.msra.mxu1 %v2128_v40  ;;  %v2176_v40 = vld [vmem:[%s2620_s1 + $0x1a0] sm:$0xff]   ;;  %v2178_v42 = vld [vmem:[%s2620_s1 + $0x228] sm:$0xff]  }
  0x2d   : > { %1873 = vmatprep.subr.bf16.mxu0 %v2132_v43  ;;  %2001 = vmatprep.subr.bf16.mxu1 %v2133_v44  ;;  %v1644_v43 = vcombine.high %v2388_v48, %v2412_v57 }
  0x2f   : > { %583 = vmatmul.mubr.bf16.gmra.mrb[4].mxu0 %v1601_v46  ;;  %1994 = vmatmul.mubr.bf16.gmra.mrb[4].mxu1 %v1609_v4  ;;  %v2184_v46 = vld [vmem:[%s2620_s1 + $0x1f0] sm:$0xff]  }
  0x30   : > { %1874 = vmatpush3.bf16.msra.mxu0 %v2134_v45  ;;  %2002 = vmatpush3.bf16.msra.mxu1 %v2133_v44  ;;  %v1727_v44 = vcombine.low %v2426_v62, %v989_v39  ;;  %v2179_v45 = vld [vmem:[%s2620_s1 + $0x1a8] sm:$0xff]  }
  0x31   : > { %1875 = vmatprep.subr.bf16.mxu0 %v2135_v49  ;;  %2003 = vmatprep.subr.bf16.mxu1 %v2136_v50  ;;  %v1643_v49 = vcombine.low %v2388_v48, %v2412_v57  ;;  %v2189_v48 = vld [vmem:[%s2620_s1 + $0x1b8] sm:$0xff]  }
  0x32   : > { %590 = vmatprep.mubr.bf16.mxu0 %v1605_v51  ;;  %2013 = vmatprep.mubr.bf16.mxu1 %v1636_v5  ;;  %v2187_v51 = vld [vmem:[%s2620_s1 + $0x1f8] sm:$0xff]  }
  0x34   : > { %1876 = vmatpush3.bf16.msra.mxu0 %v2137_v52  ;;  %2004 = vmatpush3.bf16.msra.mxu1 %v2136_v50  ;;  %v2186_v50 = vld [vmem:[%s2620_s1 + $0x1b0] sm:$0xff]   ;;  %v2188_v52 = vld [vmem:[%s2620_s1 + $0x238] sm:$0xff]  }
  0x35   : > { %1877 = vmatprep.subr.bf16.mxu0 %v2140_v53  ;;  %2005 = vmatprep.subr.bf16.mxu1 %v2141_v54  ;;  %v2191_v53 = vld [vmem:[%s2307_s10 + $0x38] ss:$12 sps:$4 sm:$0xff]  }
  0x37   : > { %591 = vmatmul.mubr.bf16.gmra.mrb[8].mxu0 %v1604_v60 }
  0x38   : > { %1878 = vmatpush3.bf16.msra.mxu0 %v2142_v56  ;;  %2006 = vmatpush3.bf16.msra.mxu1 %v2141_v54  ;;  %v2192_v54 = vld [vmem:[%s2307_s10 + $0x50] ss:$12 sps:$4 sm:$0xff]   ;;  %v1728_v56 = vcombine.high %v2426_v62, %v989_v39  ;;  %s1765_s10 = sshll.u32 %s2625_s16, 5 }
  0x39   : > { %1879 = vmatprep.subr.bf16.mxu0 %v2143_v61  ;;  %2007 = vmatprep.subr.bf16.mxu1 %v2144_v0  ;;  %s2582_s27 = scalar_lea.vmem %s2622_s3, %s1765_s10  ;;  %s2598_s6 = scalar_lea.vmem %s2623_s4, %s1765_s10 }
  0x3a   : > { %598 = vmatprep.mubr.bf16.mxu0 %v1608_v3 }
  0x3c   : > { %1880 = vmatpush3.bf16.msra.mxu0 %v2145_v6  ;;  %2008 = vmatpush3.bf16.msra.mxu1 %v2144_v0 }
  0x3d   : > { %1881 = vmatprep.subr.bf16.mxu0 %v2149_v7  ;;  %2009 = vmatprep.subr.bf16.mxu1 %v2150_v8 }
  0x3f   : > { %599 = vmatmul.mubr.bf16.gmra.mrb[12].mxu0 %v1607_v10 }
  0x40   : > { %1882 = vmatpush3.bf16.msra.mxu0 %v2152_v9  ;;  %2010 = vmatpush3.bf16.msra.mxu1 %v2150_v8 }
  0x41   : > { %1883 = vmatprep.subr.bf16.mxu0 %v2153_v12  ;;  %2011 = vmatprep.subr.bf16.mxu1 %v2154_v13 }
  0x42   : > { %877 = vmatprep.mubr.bf16.mxu0 %v1635_v14 }
  0x44   : > { %1884 = vmatpush3.bf16.msra.mxu0 %v2155_v15  ;;  %2012 = vmatpush3.bf16.msra.mxu1 %v2154_v13 }
  0x45   : > { %1921 = vmatprep.subr.bf16.mxu0 %v2158_v16  ;;  %2021 = vmatprep.subr.bf16.mxu1 %v2159_v17 }
  0x47   : > { %878 = vmatmul.mubr.bf16.vlgmr.msra.gmra.mrb[16].mxu0 %v1634_v19  ;;  %2014 = vmatmul.mubr.bf16.vlgmr.msra.gmra.mrb[0].mxu1 %v1639_v18 }
  0x48   : > { %1922 = vmatpush3.bf16.msra.mxu0 %v2160_v20  ;;  %2022 = vmatpush3.bf16.msra.mxu1 %v2159_v17 }
  0x49   : > { %1923 = vmatprep.subr.bf16.mxu0 %v2161_v21  ;;  %2023 = vmatprep.subr.bf16.mxu1 %v2162_v24 }
  0x4a   : > { %885 = vmatprep.mubr.bf16.mxu0 %v2486_v25  ;;  %2017 = vmatprep.mubr.bf16.mxu1 %v1642_v22 }
  0x4c   : > { %1924 = vmatpush3.bf16.msra.mxu0 %v2163_v26  ;;  %2024 = vmatpush3.bf16.msra.mxu1 %v2162_v24 }
  0x4d   : > { %1925 = vmatprep.subr.bf16.mxu0 %v2166_v27  ;;  %2025 = vmatprep.subr.bf16.mxu1 %v2167_v28 }
  0x4f   : > { %886 = vmatmul.mubr.bf16.gmra.mrb[20].mxu0 %v1637_v29  ;;  %2018 = vmatmul.mubr.bf16.gmra.mrb[4].mxu1 %v1645_v31 }
  0x50   : > { %1926 = vmatpush3.bf16.msra.mxu0 %v2168_v30  ;;  %2026 = vmatpush3.bf16.msra.mxu1 %v2167_v28 }
  0x51   : > { %1927 = vmatprep.subr.bf16.mxu0 %v2169_v32  ;;  %2027 = vmatprep.subr.bf16.mxu1 %v2170_v23 }
  0x52   : > { %893 = vmatprep.mubr.bf16.mxu0 %v1641_v33  ;;  %2037 = vmatprep.mubr.bf16.mxu1 %v2190_v37 }
  0x54   : > { %1928 = vmatpush3.bf16.msra.mxu0 %v2171_v34  ;;  %2028 = vmatpush3.bf16.msra.mxu1 %v2170_v23 }
  0x55   : > { %1929 = vmatprep.subr.bf16.mxu0 %v2174_v35  ;;  %2029 = vmatprep.subr.bf16.mxu1 %v2175_v36 }
  0x57   : > { %894 = vmatmul.mubr.bf16.gmra.mrb[24].mxu0 %v1640_v38 }
  0x58   : > { %1930 = vmatpush3.bf16.msra.mxu0 %v2176_v40  ;;  %2030 = vmatpush3.bf16.msra.mxu1 %v2175_v36 }
  0x59   : > { %1931 = vmatprep.subr.bf16.mxu0 %v2177_v41  ;;  %2031 = vmatprep.subr.bf16.mxu1 %v2178_v42 }
  0x5a   : > { %901 = vmatprep.mubr.bf16.mxu0 %v1644_v43 }
  0x5c   : > { %1932 = vmatpush3.bf16.msra.mxu0 %v2179_v45  ;;  %2032 = vmatpush3.bf16.msra.mxu1 %v2178_v42 }
  0x5d   : > { %1933 = vmatprep.subr.bf16.mxu0 %v2184_v46  ;;  %2033 = vmatprep.subr.bf16.mxu1 %v2185_v47 }
  0x5f   : > { %902 = vmatmul.mubr.bf16.gmra.mrb[28].mxu0 %v1643_v49 }
  0x60   : > { %1934 = vmatpush3.bf16.msra.mxu0 %v2186_v50  ;;  %2034 = vmatpush3.bf16.msra.mxu1 %v2185_v47 }
  0x61   : > { %1935 = vmatprep.subr.bf16.mxu0 %v2187_v51  ;;  %2035 = vmatprep.subr.bf16.mxu1 %v2188_v52 }
  0x62   : > { %1280 = vmatprep.mubr.bf16.mxu0 %v2486_v25 }
  0x64   : > { %1936 = vmatpush3.bf16.msra.mxu0 %v2189_v48  ;;  %2036 = vmatpush3.bf16.msra.mxu1 %v2188_v52 }
  0x67   : > { %1281 = vmatmul.mubr.bf16.vlgmr.msra.gmra.mrb[32].mxu0 %v1637_v29  ;;  %2038 = vmatmul.mubr.bf16.vlgmr.msra.gmra.mrb[0].mxu1 %v2191_v53 }
  0x68   : > { %1288 = vmatprep.mubr.bf16.mxu0 %v1641_v33  ;;  %2041 = vmatprep.mubr.bf16.mxu1 %v2192_v54 }
  0x6f   : > { %1289 = vmatmul.mubr.bf16.gmra.mrb[36].mxu0 %v1640_v38  ;;  %2042 = vmatmul.mubr.bf16.gmra.mrb[4].mxu1 %v2193_v55 }
  0x70   : > { %1296 = vmatprep.mubr.bf16.mxu0 %v1644_v43 }
  0x77   : > { %1297 = vmatmul.mubr.bf16.gmra.mrb[40].mxu0 %v1643_v49 }
  0x78   : > { %1304 = vmatprep.mubr.bf16.mxu0 %v1728_v56  ;;  %v1776_v56 = vld [vmem:[%s2582_s27] sm:$0xff]  }
  0x7f   : > { %1305 = vmatmul.mubr.bf16.gmra.mrb[44].mxu0 %v1727_v44 }
  0xfa   : > { %v1833_v57 = vpop.f32.mrb[0].mxu0 }
  0xfb   : > { %v1834_v58 = vpop.f32.mrb[1].mxu0 }
  0xfc   : > { %v1835_v59 = vadd.f32 %v1834_v58, %v1833_v57  ;;  %v1836_v60 = vpop.f32.mrb[2].mxu0 }
  0xfd   : > { %v1837_v61 = vpop.f32.mrb[3].mxu0 }
  0xfe   : > { %v1838_v63 = vadd.f32 %v1837_v61, %v1836_v60  ;;  %v2588_v61 = vld [vmem:[%s2621_s2] ss:$0 sm:$0xff] }
 0x102   : > { %v1839_v0 = vpop.f32.mrb[4].mxu0 }
 0x103   : > { %v1840_v1 = vpop.f32.mrb[5].mxu0 }
 0x104   : > { %v1841_v2 = vadd.f32 %v1840_v1, %v1839_v0  ;;  %v1842_v3 = vpop.f32.mrb[6].mxu0  ;;  %v1777_v0 = vunpack.c.l.bf16 %v1776_v56 }
 0x105   : > { %v1843_v4 = vpop.f32.mrb[7].mxu0 }
 0x106   : > { %v1844_v5 = vadd.f32 %v1843_v4, %v1842_v3  ;;  %v1778_v4 = vunpack.c.h.bf16 %v1776_v56  ;;  %v1813_v56 = vld [vmem:[%s2582_s27 + $0x18] sm:$0xff]  }
 0x10a   : > { %v1845_v6 = vpop.f32.mrb[8].mxu0 }
 0x10b   : > { %v1846_v7 = vpop.f32.mrb[9].mxu0 }
 0x10c   : > { %v1847_v8 = vadd.f32 %v1846_v7, %v1845_v6  ;;  %v1848_v9 = vpop.f32.mrb[10].mxu0 }
 0x10d   : > { %v1849_v62 = vpop.f32.mrb[11].mxu0 }
 0x10e   : > { %v1850_v10 = vadd.f32 %v1849_v62, %v1848_v9 }
 0x112   : > { %v1851_v11 = vpop.f32.mrb[12].mxu0 }
 0x113   : > { %v1852_v12 = vpop.f32.mrb[13].mxu0 }
 0x114   : > { %v1853_v13 = vadd.f32 %v1852_v12, %v1851_v11  ;;  %v1854_v14 = vpop.f32.mrb[14].mxu0  ;;  %v1811_v11 = vld [vmem:[%s2582_s27 + $0x8] sm:$0xff]  }
 0x115   : > { %v1855_v15 = vpop.f32.mrb[15].mxu0 }
 0x116   : > { %v1856_v16 = vadd.f32 %v1855_v15, %v1854_v14 }
 0x11a   : > { %v1885_v17 = vpop.f32.mrb[16].mxu0 }
 0x11b   : > { %v1886_v18 = vpop.f32.mrb[17].mxu0 }
 0x11c   : > { %v1887_v19 = vadd.f32 %v1886_v18, %v1885_v17  ;;  %v1888_v20 = vpop.f32.mrb[18].mxu0 }
 0x11d   : > { %v1889_v21 = vpop.f32.mrb[19].mxu0 }
 0x11e   : > { %v2048_v24 = vadd.f32 %v1887_v19, %v1835_v59  ;;  %v1890_v25 = vadd.f32 %v1889_v21, %v1888_v20  ;;  %v1781_v19 = vunpack.c.l.bf16 %v1811_v11 }
 0x120   : > { %v2054_v22 = vadd.f32 %v1890_v25, %v1838_v63 }
 0x122   : > { %v1891_v26 = vpop.f32.mrb[20].mxu0 }
 0x123   : > { %v1892_v27 = vpop.f32.mrb[21].mxu0 }
 0x124   : > { %v1893_v28 = vadd.f32 %v1892_v27, %v1891_v26  ;;  %v1894_v29 = vpop.f32.mrb[22].mxu0 }
 0x125   : > { %v1895_v30 = vpop.f32.mrb[23].mxu0 }
 0x126   : > { %v2045_v31 = vadd.f32 %v1893_v28, %v1841_v2  ;;  %v1896_v32 = vadd.f32 %v1895_v30, %v1894_v29  ;;  %v1782_v28 = vunpack.c.h.bf16 %v1811_v11 }
 0x128   : > { %v2051_v23 = vadd.f32 %v1896_v32, %v1844_v5 }
 0x12a   : > { %v1897_v33 = vpop.f32.mrb[24].mxu0 }
 0x12b   : > { %v1898_v34 = vpop.f32.mrb[25].mxu0 }
 0x12c   : > { %v1899_v35 = vadd.f32 %v1898_v34, %v1897_v33  ;;  %v1900_v36 = vpop.f32.mrb[26].mxu0 }
 0x12d   : > { %v1901_v37 = vpop.f32.mrb[27].mxu0 }
 0x12e   : > { %v2568_v38 = vadd.f32 %v1899_v35, %v1847_v8  ;;  %v1902_v40 = vadd.f32 %v1901_v37, %v1900_v36 }
 0x130   : > { %v2570_v41 = vadd.f32 %v1902_v40, %v1850_v10 }
 0x132   : > { %v1903_v42 = vpop.f32.mrb[28].mxu0 }
 0x133   : > { %v1904_v43 = vpop.f32.mrb[29].mxu0 }
 0x134   : > { %v1905_v39 = vadd.f32 %v1904_v43, %v1903_v42  ;;  %v1906_v44 = vpop.f32.mrb[30].mxu0 }
 0x135   : > { %v1907_v45 = vpop.f32.mrb[31].mxu0 }
 0x136   : > { %v2572_v46 = vadd.f32 %v1905_v39, %v1853_v13  ;;  %v1908_v47 = vadd.f32 %v1907_v45, %v1906_v44 }
 0x138   : > { %v2575_v49 = vadd.f32 %v1908_v47, %v1856_v16 }
 0x13a   : > { %v1937_v50 = vpop.f32.mrb[32].mxu0  ;;  %v2039_v51 = vpop.f32.mrb[0].mxu1 }
 0x13b   : > { %v1938_v52 = vpop.f32.mrb[33].mxu0  ;;  %v1347_v48 = vpop.f32.mrb[1].mxu1 }
 0x13c   : > { %v1939_v53 = vadd.f32 %v1938_v52, %v1937_v50  ;;  %v1940_v54 = vpop.f32.mrb[34].mxu0  ;;  %v2040_v55 = vpop.f32.mrb[2].mxu1 }
 0x13d   : > { %v1941_v57 = vpop.f32.mrb[35].mxu0  ;;  %v1350_v58 = vpop.f32.mrb[3].mxu1 }
 0x13e   : > { %v2049_v59 = vadd.f32 %v2048_v24, %v1939_v53  ;;  %v1942_v60 = vadd.f32 %v1941_v57, %v1940_v54 }
 0x140   : > { %v2050_v63 = vadd.f32 %v2049_v59, %v1347_v48  ;;  %v2055_v1 = vadd.f32 %v2054_v22, %v1942_v60 }
 0x142   : > { %v1393_v2 = vadd.f32 %v2050_v63, %v2588_v61  ;;  %v2056_v3 = vadd.f32 %v2055_v1, %v1350_v58  ;;  %v1943_v5 = vpop.f32.mrb[36].mxu0  ;;  %v2043_v6 = vpop.f32.mrb[4].mxu1  ;;  %v1789_v63 = vunpack.c.l.bf16 %v1813_v56 }
 0x143   : > { %v1944_v7 = vpop.f32.mrb[37].mxu0  ;;  %v1363_v8 = vpop.f32.mrb[5].mxu1 }
 0x144   : > { %v1417_v9 = vadd.f32 %v1777_v0, %v1393_v2  ;;  %v1394_v62 = vadd.f32 %v2056_v3, %v2588_v61  ;;  %v1945_v10 = vadd.f32 %v1944_v7, %v1943_v5  ;;  %v1946_v12 = vpop.f32.mrb[38].mxu0  ;;  %v2044_v13 = vpop.f32.mrb[6].mxu1 }
 0x145   : > { %v1947_v14 = vpop.f32.mrb[39].mxu0  ;;  %v1366_v15 = vpop.f32.mrb[7].mxu1 }
 0x146   : > { %v1418_v16 = vadd.f32 %v1778_v4, %v1394_v62  ;;  %v2046_v17 = vadd.f32 %v2045_v31, %v1945_v10  ;;  %v1948_v18 = vadd.f32 %v1947_v14, %v1946_v12  ;;  %v1425_v20 = vmax.f32 %v1417_v9, 0.0 }
 0x148   : > { %v1426_v21 = vmax.f32 %v1418_v16, 0.0  ;;  %v2047_v24 = vadd.f32 %v2046_v17, %v2039_v51  ;;  %v2052_v25 = vadd.f32 %v2051_v23, %v1948_v18  ;;  %v1812_v23 = vld [vmem:[%s2582_s27 + $0x10] sm:$0xff]  }
 0x149   : > { %v1785_v42 = vunpack.c.l.bf16 %v1812_v23  ;;  %v1786_v52 = vunpack.c.h.bf16 %v1812_v23 }
 0x14a   : > { %v1794_v22 = vpack.c.bf16 %v1426_v21, %v1425_v20  ;;  %v1395_v26 = vadd.f32 %v2047_v24, %v2588_v61  ;;  %v2053_v27 = vadd.f32 %v2052_v25, %v2040_v55  ;;  %v1949_v29 = vpop.f32.mrb[40].mxu0 }
 0x14b   : > { %v1950_v30 = vpop.f32.mrb[41].mxu0 }
 0x14c   : > { %1795 = vst [vmem:[%s2598_s6] sm:$0xff] %v1794_v22   ;;  %v1419_v31 = vadd.f32 %v1781_v19, %v1395_v26  ;;  %v1396_v32 = vadd.f32 %v2053_v27, %v2588_v61  ;;  %v1951_v33 = vadd.f32 %v1950_v30, %v1949_v29  ;;  %v1952_v34 = vpop.f32.mrb[42].mxu0 }
 0x14d   : > { %v1953_v35 = vpop.f32.mrb[43].mxu0 }
 0x14e   : > { %v1420_v36 = vadd.f32 %v1782_v28, %v1396_v32  ;;  %v2061_v37 = vadd.f32 %v2568_v38, %v1951_v33  ;;  %v1954_v40 = vadd.f32 %v1953_v35, %v1952_v34  ;;  %v1427_v43 = vmax.f32 %v1419_v31, 0.0 }
 0x150   : > { %v1428_v39 = vmax.f32 %v1420_v36, 0.0  ;;  %v2062_v44 = vadd.f32 %v2061_v37, %v1363_v8  ;;  %v2067_v45 = vadd.f32 %v2570_v41, %v1954_v40  ;;  %v1790_v8 = vunpack.c.h.bf16 %v1813_v56 }
 0x152   : > { %v1799_v47 = vpack.c.bf16 %v1428_v39, %v1427_v43  ;;  %v1397_v50 = vadd.f32 %v2062_v44, %v2588_v61  ;;  %v2068_v51 = vadd.f32 %v2067_v45, %v1366_v15  ;;  %v1955_v48 = vpop.f32.mrb[44].mxu0 }
 0x153   : > { %v1956_v53 = vpop.f32.mrb[45].mxu0 }
 0x154   : > { %1814 = vst [vmem:[%s2598_s6 + $0x8] sm:$0xff] %v1799_v47   ;;  %v1421_v54 = vadd.f32 %v1785_v42, %v1397_v50  ;;  %v1398_v55 = vadd.f32 %v2068_v51, %v2588_v61  ;;  %v1957_v38 = vadd.f32 %v1956_v53, %v1955_v48  ;;  %v1958_v57 = vpop.f32.mrb[46].mxu0 }
 0x155   : > { %v1959_v58 = vpop.f32.mrb[47].mxu0 }
 0x156   : > { %v1422_v59 = vadd.f32 %v1786_v52, %v1398_v55  ;;  %v2058_v60 = vadd.f32 %v2572_v46, %v1957_v38  ;;  %v1960_v41 = vadd.f32 %v1959_v58, %v1958_v57  ;;  %v1429_v0 = vmax.f32 %v1421_v54, 0.0 }
 0x158   : > { %v1430_v1 = vmax.f32 %v1422_v59, 0.0  ;;  %v2059_v2 = vadd.f32 %v2058_v60, %v2043_v6  ;;  %v2064_v3 = vadd.f32 %v2575_v49, %v1960_v41 }
 0x15a   : > { %v1804_v4 = vpack.c.bf16 %v1430_v1, %v1429_v0  ;;  %v1399_v5 = vadd.f32 %v2059_v2, %v2588_v61  ;;  %v2065_v7 = vadd.f32 %v2064_v3, %v2044_v13 }
 0x15c   : > { %1815 = vst [vmem:[%s2598_s6 + $0x10] sm:$0xff] %v1804_v4   ;;  %v1423_v9 = vadd.f32 %v1789_v63, %v1399_v5  ;;  %v1400_v62 = vadd.f32 %v2065_v7, %v2588_v61 }
 0x15e   : > { %v1424_v10 = vadd.f32 %v1790_v8, %v1400_v62  ;;  %v1431_v11 = vmax.f32 %v1423_v9, 0.0 }
 0x160   : > { %v1432_v46 = vmax.f32 %v1424_v10, 0.0 }
 0x162   : > { %v1809_v12 = vpack.c.bf16 %v1432_v46, %v1431_v11 }
 0x164   : > { %1816 = vst [vmem:[%s2598_s6 + $0x18] sm:$0xff] %v1809_v12  }
 0x165 PF: > { %s14_s15 = sadd.s32 1, %s2202_s15  }
 0x166   : > { %p11_p4 = scmp.ge.s32.totalorder %s14_s15, 4  }
 0x168   :  { %13 = sbr.rel (!%p11_p4) target bundleno = 1 (0x1), region = 71 }

</bundles_post_ra>
